<compile_context>
chip_gen: v7x
topology: tpu7x:2x2x1
jax: 0.10.0
libtpu: 0.0.40
codegen_flags: <defaults>
</compile_context>

<pallas_src>
import math

import jax
import jax.numpy as jnp
from jax import lax
from jax.experimental import pallas as pl
from jax.experimental.pallas import tpu as pltpu


NUM_BILL_SHAPE = 9    # len(class_dict['has_bill_shape'])
NUM_WING_COLOR = 15   # len(class_dict['has_wing_color'])
NUM_HEAD_TOTAL = NUM_BILL_SHAPE + NUM_WING_COLOR   # 24
HEAD_PAD = 32                                      # padded head width (full-extent block)
FEAT = 1000                                        # encoder feature dim
TB_MAX = 1024                                      # max batch tile (rows)


def _round_up(n, m):
    return ((n + m - 1) // m) * m


def _cdiv(a, b):
    return -(-a // b)


def mtl_kernel(x_ref,
               w1_ref, b1_ref,
               w2_ref, b2_ref,
               w3_ref, b3_ref,
               wh_ref, bh_ref,
               out_ref):
    # x tile: (TB, 1000) f32 -> cast to bf16 in-kernel (saves a wrapper HBM pass)
    x = x_ref[...].astype(jnp.bfloat16)

    # fc1 + relu  (dropout is identity in eval mode)
    h1 = jnp.dot(x, w1_ref[...], preferred_element_type=jnp.float32) + b1_ref[...]
    h1 = jnp.maximum(h1, 0.0).astype(jnp.bfloat16)

    # fc2 + relu
    h2 = jnp.dot(h1, w2_ref[...], preferred_element_type=jnp.float32) + b2_ref[...]
    h2 = jnp.maximum(h2, 0.0).astype(jnp.bfloat16)

    # fc3 + relu
    h3 = jnp.dot(h2, w3_ref[...], preferred_element_type=jnp.float32) + b3_ref[...]
    h3 = jnp.maximum(h3, 0.0).astype(jnp.bfloat16)

    # fused task heads: single (256, 32) matmul -> logits (TB, 32) f32
    logits = jnp.dot(h3, wh_ref[...], preferred_element_type=jnp.float32) + bh_ref[...]

    # per-head softmax, single exp pass.
    # lanes 0..8 = bill_shape, 9..23 = wing_color, 24..31 = zero padding
    col = lax.broadcasted_iota(jnp.int32, logits.shape, 1)
    mask_a = col < NUM_BILL_SHAPE
    mask_b = jnp.logical_and(col >= NUM_BILL_SHAPE, col < NUM_HEAD_TOTAL)
    mask_valid = col < NUM_HEAD_TOTAL

    neg = jnp.float32(-1e30)
    ma = jnp.max(jnp.where(mask_a, logits, neg), axis=-1, keepdims=True)
    mb = jnp.max(jnp.where(mask_b, logits, neg), axis=-1, keepdims=True)
    m = jnp.where(mask_a, ma, mb)                      # per-lane head max
    e = jnp.exp(logits - m)                            # one (TB, 32) exp pass
    e = jnp.where(mask_valid, e, 0.0)

    da = jnp.sum(jnp.where(mask_a, e, 0.0), axis=-1, keepdims=True)
    db = jnp.sum(jnp.where(mask_b, e, 0.0), axis=-1, keepdims=True)
    denom = jnp.where(mask_a, da, db)

    # exact normalization (rows sum to 1 within f32 rounding)
    out_ref[...] = e / denom


def prepare_params(params):
    """One-time layout plumbing: bf16 weights, fused+padded heads, f32 biases."""
    (w1, b1, w2, b2, w3, b3, wa, ba, wb, bb) = params
    w1_b = w1.astype(jnp.bfloat16)                      # (1000, 512)
    w2_b = w2.astype(jnp.bfloat16)                      # (512, 256)
    w3_b = w3.astype(jnp.bfloat16)                      # (256, 256)
    wh = jnp.pad(jnp.concatenate([wa, wb], axis=1),
                 ((0, 0), (0, HEAD_PAD - NUM_HEAD_TOTAL))).astype(jnp.bfloat16)   # (256, 32)
    bh = jnp.pad(jnp.concatenate([ba, bb], axis=1),
                 ((0, 0), (0, HEAD_PAD - NUM_HEAD_TOTAL))).astype(jnp.float32)    # (1, 32)
    return (w1_b, b1.astype(jnp.float32),
            w2_b, b2.astype(jnp.float32),
            w3_b, b3.astype(jnp.float32),
            wh, bh)


def multi_task_forward(x, prepared):
    """x: [B, 1000] encoder features (f32). prepared: output of prepare_params.
    Returns (probs_bill_shape [B,9], probs_wing_color [B,15])."""
    B = x.shape[0]
    (w1, b1, w2, b2, w3, b3, wh, bh) = prepared

    # ---- adaptive batch tiling (waste < 8*steps rows) ----
    B_pad8 = _round_up(max(B, 8), 8)
    if B_pad8 >= 512:
        # >= 2 steps and an even step count so the "parallel" axis shards
        # across both v7x TensorCores; tiles capped at TB_MAX rows.
        num_steps = max(2, _cdiv(B_pad8, TB_MAX))
        if num_steps % 2:
            num_steps += 1
    else:
        num_steps = 1
    TB = _round_up(_cdiv(B_pad8, num_steps), 8)
    B_pad = TB * num_steps
    grid = (num_steps,)

    x_in = x if B_pad == B else jnp.pad(x, ((0, B_pad - B), (0, 0)))

    const_map = lambda i: (0, 0)

    # deeper pipelining on the x stream only when the grid is deep enough
    if num_steps >= 3:
        x_spec = pl.BlockSpec((TB, FEAT), lambda i: (i, 0),
                              pipeline_mode=pl.Buffered(3))
    else:
        x_spec = pl.BlockSpec((TB, FEAT), lambda i: (i, 0))

    flops = 2 * B_pad * (FEAT * 512 + 512 * 256 + 256 * 256 + 256 * HEAD_PAD)
    bytes_accessed = (B_pad * FEAT * 4
                      + (FEAT * 512 + 512 * 256 + 256 * 256 + 256 * HEAD_PAD) * 2
                      + (512 + 256 + 256 + HEAD_PAD) * 4
                      + B_pad * HEAD_PAD * 4)
    cost = pl.CostEstimate(flops=flops,
                           transcendentals=B_pad * HEAD_PAD,
                           bytes_accessed=bytes_accessed)

    out = pl.pallas_call(
        mtl_kernel,
        out_shape=jax.ShapeDtypeStruct((B_pad, HEAD_PAD), jnp.float32),
        grid_spec=pltpu.PrefetchScalarGridSpec(
            num_scalar_prefetch=0,
            grid=grid,
            in_specs=[
                x_spec,                                   # x tile (f32, full-extent lanes)
                pl.BlockSpec((FEAT, 512), const_map),     # w1 (VMEM-resident)
                pl.BlockSpec((1, 512), const_map),        # b1
                pl.BlockSpec((512, 256), const_map),      # w2
                pl.BlockSpec((1, 256), const_map),        # b2
                pl.BlockSpec((256, 256), const_map),      # w3
                pl.BlockSpec((1, 256), const_map),        # b3
                pl.BlockSpec((256, HEAD_PAD), const_map), # fused head W
                pl.BlockSpec((1, HEAD_PAD), const_map),   # fused head b
            ],
            out_specs=pl.BlockSpec((TB, HEAD_PAD), lambda i: (i, 0)),
        ),
        compiler_params=pltpu.CompilerParams(
            dimension_semantics=("parallel",)),
        cost_estimate=cost,
    )(x_in, w1, b1, w2, b2, w3, b3, wh, bh)

    probs_bill = out[:B, :NUM_BILL_SHAPE]
    probs_wing = out[:B, NUM_BILL_SHAPE:NUM_HEAD_TOTAL]
    return probs_bill, probs_wing


# ----------------------------- parameter init -----------------------------

def _xavier_normal(key, fan_in, fan_out):
    std = math.sqrt(2.0 / (fan_in + fan_out))
    # stored as (in_features, out_features) == PyTorch weight.T
    return std * jax.random.normal(key, (fan_in, fan_out), dtype=jnp.float32)


def _default_bias(key, fan_in, fan_out):
    bound = 1.0 / math.sqrt(fan_in)
    return jax.random.uniform(key, (1, fan_out), dtype=jnp.float32,
                              minval=-bound, maxval=bound)


def init_params(key):
    keys = jax.random.split(key, 10)
    # fc1: 1000 -> 512  (xavier_normal weight)
    w1 = _xavier_normal(keys[0], FEAT, 512)
    b1 = _default_bias(keys[1], FEAT, 512)
    # fc2: 512 -> 256   (xavier_normal weight)
    w2 = _xavier_normal(keys[2], 512, 256)
    b2 = _default_bias(keys[3], 512, 256)
    # fc3: 256 -> 256   (PyTorch default init; synthetic deterministic init here)
    bound3 = 1.0 / math.sqrt(256)
    w3 = jax.random.uniform(keys[4], (256, 256), dtype=jnp.float32,
                            minval=-bound3, maxval=bound3)
    b3 = _default_bias(keys[5], 256, 256)
    # head 'has_bill_shape': 256 -> 9  (xavier_normal weight)
    wa = _xavier_normal(keys[6], 256, NUM_BILL_SHAPE)
    ba = _default_bias(keys[7], 256, NUM_BILL_SHAPE)
    # head 'has_wing_color': 256 -> 15 (xavier_normal weight)
    wb = _xavier_normal(keys[8], 256, NUM_WING_COLOR)
    bb = _default_bias(keys[9], 256, NUM_WING_COLOR)
    return (w1, b1, w2, b2, w3, b3, wa, ba, wb, bb)


def reference_forward(x, params):
    (w1, b1, w2, b2, w3, b3, wa, ba, wb, bb) = params
    h1 = jnp.maximum(x @ w1 + b1, 0.0)
    h2 = jnp.maximum(h1 @ w2 + b2, 0.0)
    h3 = jnp.maximum(h2 @ w3 + b3, 0.0)
    pa = jax.nn.softmax(h3 @ wa + ba, axis=1)
    pb = jax.nn.softmax(h3 @ wb + bb, axis=1)
    return pa, pb


if __name__ == "__main__":
    key = jax.random.PRNGKey(0)
    k_param, k_x = jax.random.split(key)

    B = 8  # batch (sublane-aligned)
    params = init_params(k_param)
    prepared = prepare_params(params)          # one-time weight layout plumbing
    # encoder output features: [B, 1000]
    x = jax.random.normal(k_x, (B, FEAT), dtype=jnp.float32)

    probs_bill, probs_wing = multi_task_forward(x, prepared)
    probs_bill = jax.block_until_ready(probs_bill)
    probs_wing = jax.block_until_ready(probs_wing)

    # sanity check against a pure-JAX f32 reference (bf16 matmuls -> relaxed
    # elementwise tolerance; normalization is exact division -> tight row sums)
    ref_bill, ref_wing = reference_forward(x, params)
    assert probs_bill.shape == (B, NUM_BILL_SHAPE)
    assert probs_wing.shape == (B, NUM_WING_COLOR)
    assert jnp.allclose(probs_bill, ref_bill, atol=2e-2, rtol=2e-2)
    assert jnp.allclose(probs_wing, ref_wing, atol=2e-2, rtol=2e-2)
    # softmax rows sum to 1 (exact division, f32 accumulation)
    assert jnp.allclose(jnp.sum(probs_bill, axis=1), 1.0, atol=2e-3)
    assert jnp.allclose(jnp.sum(probs_wing, axis=1), 1.0, atol=2e-3)

    print("KERNEL_OK")
</pallas_src>

<mosaic_0001>
module attributes {stable_mosaic.version = 11 : i64} {
  func.func @mtl_kernel(%arg0: i32, %arg1: memref<8x1000xf32, #tpu.memory_space<vmem>>, %arg2: memref<1000x512xbf16, #tpu.memory_space<vmem>>, %arg3: memref<1x512xf32, #tpu.memory_space<vmem>>, %arg4: memref<512x256xbf16, #tpu.memory_space<vmem>>, %arg5: memref<1x256xf32, #tpu.memory_space<vmem>>, %arg6: memref<256x256xbf16, #tpu.memory_space<vmem>>, %arg7: memref<1x256xf32, #tpu.memory_space<vmem>>, %arg8: memref<256x32xbf16, #tpu.memory_space<vmem>>, %arg9: memref<1x32xf32, #tpu.memory_space<vmem>>, %arg10: memref<8x32xf32, #tpu.memory_space<vmem>>) attributes {dimension_semantics = [#tpu.dimension_semantics<parallel>], iteration_bounds = array<i64: 1>, scalar_prefetch = 0 : i64, scratch_operands = 0 : i64, tpu.core_type = #tpu.core_type<tc>, window_params = [{transform_indices = @transform_0, window_bounds = array<i64: 8, 1000>}, {pipeline_mode = #tpu.pipeline_mode<synchronous>, transform_indices = @transform_1, window_bounds = array<i64: 1000, 512>}, {pipeline_mode = #tpu.pipeline_mode<synchronous>, transform_indices = @transform_2, window_bounds = array<i64: 1, 512>}, {pipeline_mode = #tpu.pipeline_mode<synchronous>, transform_indices = @transform_3, window_bounds = array<i64: 512, 256>}, {pipeline_mode = #tpu.pipeline_mode<synchronous>, transform_indices = @transform_4, window_bounds = array<i64: 1, 256>}, {pipeline_mode = #tpu.pipeline_mode<synchronous>, transform_indices = @transform_5, window_bounds = array<i64: 256, 256>}, {pipeline_mode = #tpu.pipeline_mode<synchronous>, transform_indices = @transform_6, window_bounds = array<i64: 1, 256>}, {pipeline_mode = #tpu.pipeline_mode<synchronous>, transform_indices = @transform_7, window_bounds = array<i64: 256, 32>}, {pipeline_mode = #tpu.pipeline_mode<synchronous>, transform_indices = @transform_8, window_bounds = array<i64: 1, 32>}, {transform_indices = @transform_9, window_bounds = array<i64: 8, 32>}]} {
    %c0 = arith.constant 0 : index
    %c0_0 = arith.constant 0 : index
    %0 = vector.load %arg1[%c0, %c0_0] : memref<8x1000xf32, #tpu.memory_space<vmem>>, vector<8x1000xf32>
    %1 = arith.truncf %0 : vector<8x1000xf32> to vector<8x1000xbf16>
    %c0_1 = arith.constant 0 : index
    %c0_2 = arith.constant 0 : index
    %2 = vector.load %arg2[%c0_1, %c0_2] : memref<1000x512xbf16, #tpu.memory_space<vmem>>, vector<1000x512xbf16>
    %cst = arith.constant dense<0.000000e+00> : vector<8x512xf32>
    %3 = tpu.matmul %1, %2, %cst {dimension_numbers = #tpu.dot_dimension_numbers<[1], [0], [0], [1], [0, 0, 1, 1], [], []>} : vector<8x1000xbf16>, vector<1000x512xbf16>, vector<8x512xf32> -> vector<8x512xf32>
    %c0_3 = arith.constant 0 : index
    %c0_4 = arith.constant 0 : index
    %4 = vector.load %arg3[%c0_3, %c0_4] : memref<1x512xf32, #tpu.memory_space<vmem>>, vector<1x512xf32>
    %5 = vector.broadcast %4 : vector<1x512xf32> to vector<8x512xf32>
    %6 = arith.addf %3, %5 : vector<8x512xf32>
    %cst_5 = arith.constant 0.000000e+00 : f32
    %7 = vector.broadcast %cst_5 : f32 to vector<8x512xf32>
    %8 = arith.maximumf %6, %7 : vector<8x512xf32>
    %9 = arith.truncf %8 : vector<8x512xf32> to vector<8x512xbf16>
    %c0_6 = arith.constant 0 : index
    %c0_7 = arith.constant 0 : index
    %10 = vector.load %arg4[%c0_6, %c0_7] : memref<512x256xbf16, #tpu.memory_space<vmem>>, vector<512x256xbf16>
    %cst_8 = arith.constant dense<0.000000e+00> : vector<8x256xf32>
    %11 = tpu.matmul %9, %10, %cst_8 {dimension_numbers = #tpu.dot_dimension_numbers<[1], [0], [0], [1], [0, 0, 1, 1], [], []>} : vector<8x512xbf16>, vector<512x256xbf16>, vector<8x256xf32> -> vector<8x256xf32>
    %c0_9 = arith.constant 0 : index
    %c0_10 = arith.constant 0 : index
    %12 = vector.load %arg5[%c0_9, %c0_10] : memref<1x256xf32, #tpu.memory_space<vmem>>, vector<1x256xf32>
    %13 = vector.broadcast %12 : vector<1x256xf32> to vector<8x256xf32>
    %14 = arith.addf %11, %13 : vector<8x256xf32>
    %cst_11 = arith.constant 0.000000e+00 : f32
    %15 = vector.broadcast %cst_11 : f32 to vector<8x256xf32>
    %16 = arith.maximumf %14, %15 : vector<8x256xf32>
    %17 = arith.truncf %16 : vector<8x256xf32> to vector<8x256xbf16>
    %c0_12 = arith.constant 0 : index
    %c0_13 = arith.constant 0 : index
    %18 = vector.load %arg6[%c0_12, %c0_13] : memref<256x256xbf16, #tpu.memory_space<vmem>>, vector<256x256xbf16>
    %cst_14 = arith.constant dense<0.000000e+00> : vector<8x256xf32>
    %19 = tpu.matmul %17, %18, %cst_14 {dimension_numbers = #tpu.dot_dimension_numbers<[1], [0], [0], [1], [0, 0, 1, 1], [], []>} : vector<8x256xbf16>, vector<256x256xbf16>, vector<8x256xf32> -> vector<8x256xf32>
    %c0_15 = arith.constant 0 : index
    %c0_16 = arith.constant 0 : index
    %20 = vector.load %arg7[%c0_15, %c0_16] : memref<1x256xf32, #tpu.memory_space<vmem>>, vector<1x256xf32>
    %21 = vector.broadcast %20 : vector<1x256xf32> to vector<8x256xf32>
    %22 = arith.addf %19, %21 : vector<8x256xf32>
    %cst_17 = arith.constant 0.000000e+00 : f32
    %23 = vector.broadcast %cst_17 : f32 to vector<8x256xf32>
    %24 = arith.maximumf %22, %23 : vector<8x256xf32>
    %25 = arith.truncf %24 : vector<8x256xf32> to vector<8x256xbf16>
    %c0_18 = arith.constant 0 : index
    %c0_19 = arith.constant 0 : index
    %26 = vector.load %arg8[%c0_18, %c0_19] : memref<256x32xbf16, #tpu.memory_space<vmem>>, vector<256x32xbf16>
    %cst_20 = arith.constant dense<0.000000e+00> : vector<8x32xf32>
    %27 = tpu.matmul %25, %26, %cst_20 {dimension_numbers = #tpu.dot_dimension_numbers<[1], [0], [0], [1], [0, 0, 1, 1], [], []>} : vector<8x256xbf16>, vector<256x32xbf16>, vector<8x32xf32> -> vector<8x32xf32>
    %c0_21 = arith.constant 0 : index
    %c0_22 = arith.constant 0 : index
    %28 = vector.load %arg9[%c0_21, %c0_22] : memref<1x32xf32, #tpu.memory_space<vmem>>, vector<1x32xf32>
    %29 = vector.broadcast %28 : vector<1x32xf32> to vector<8x32xf32>
    %30 = arith.addf %27, %29 : vector<8x32xf32>
    %31 = tpu.iota {dimensions = array<i32: 1>} : vector<8x32xi32>
    %c9_i32 = arith.constant 9 : i32
    %32 = vector.broadcast %c9_i32 : i32 to vector<8x32xi32>
    %33 = arith.cmpi slt, %31, %32 : vector<8x32xi32>
    %c9_i32_23 = arith.constant 9 : i32
    %34 = vector.broadcast %c9_i32_23 : i32 to vector<8x32xi32>
    %35 = arith.cmpi sge, %31, %34 : vector<8x32xi32>
    %c24_i32 = arith.constant 24 : i32
    %36 = vector.broadcast %c24_i32 : i32 to vector<8x32xi32>
    %37 = arith.cmpi slt, %31, %36 : vector<8x32xi32>
    %38 = arith.andi %35, %37 : vector<8x32xi1>
    %c24_i32_24 = arith.constant 24 : i32
    %39 = vector.broadcast %c24_i32_24 : i32 to vector<8x32xi32>
    %40 = arith.cmpi slt, %31, %39 : vector<8x32xi32>
    %cst_25 = arith.constant -1.000000e+30 : f32
    %41 = vector.broadcast %cst_25 : f32 to vector<8x32xf32>
    %42 = arith.select %33, %30, %41 : vector<8x32xi1>, vector<8x32xf32>
    %cst_26 = arith.constant dense<0xFF800000> : vector<8xf32>
    %43 = vector.multi_reduction <maximumf>, %42, %cst_26 [1] : vector<8x32xf32> to vector<8xf32>
    %44 = vector.shape_cast %43 : vector<8xf32> to vector<8x1xf32>
    %cst_27 = arith.constant -1.000000e+30 : f32
    %45 = vector.broadcast %cst_27 : f32 to vector<8x32xf32>
    %46 = arith.select %38, %30, %45 : vector<8x32xi1>, vector<8x32xf32>
    %cst_28 = arith.constant dense<0xFF800000> : vector<8xf32>
    %47 = vector.multi_reduction <maximumf>, %46, %cst_28 [1] : vector<8x32xf32> to vector<8xf32>
    %48 = vector.shape_cast %47 : vector<8xf32> to vector<8x1xf32>
    %49 = vector.shape_cast %44 : vector<8x1xf32> to vector<8x1xf32>
    %50 = vector.broadcast %49 : vector<8x1xf32> to vector<8x32xf32>
    %51 = vector.shape_cast %48 : vector<8x1xf32> to vector<8x1xf32>
    %52 = vector.broadcast %51 : vector<8x1xf32> to vector<8x32xf32>
    %53 = arith.select %33, %50, %52 : vector<8x32xi1>, vector<8x32xf32>
    %54 = arith.subf %30, %53 : vector<8x32xf32>
    %55 = math.exp %54 : vector<8x32xf32>
    %cst_29 = arith.constant 0.000000e+00 : f32
    %56 = vector.broadcast %cst_29 : f32 to vector<8x32xf32>
    %57 = arith.select %40, %55, %56 : vector<8x32xi1>, vector<8x32xf32>
    %cst_30 = arith.constant 0.000000e+00 : f32
    %58 = vector.broadcast %cst_30 : f32 to vector<8x32xf32>
    %59 = arith.select %33, %57, %58 : vector<8x32xi1>, vector<8x32xf32>
    %cst_31 = arith.constant dense<0.000000e+00> : vector<8xf32>
    %60 = vector.multi_reduction <add>, %59, %cst_31 [1] : vector<8x32xf32> to vector<8xf32>
    %61 = vector.shape_cast %60 : vector<8xf32> to vector<8x1xf32>
    %cst_32 = arith.constant 0.000000e+00 : f32
    %62 = vector.broadcast %cst_32 : f32 to vector<8x32xf32>
    %63 = arith.select %38, %57, %62 : vector<8x32xi1>, vector<8x32xf32>
    %cst_33 = arith.constant dense<0.000000e+00> : vector<8xf32>
    %64 = vector.multi_reduction <add>, %63, %cst_33 [1] : vector<8x32xf32> to vector<8xf32>
    %65 = vector.shape_cast %64 : vector<8xf32> to vector<8x1xf32>
    %66 = vector.shape_cast %61 : vector<8x1xf32> to vector<8x1xf32>
    %67 = vector.broadcast %66 : vector<8x1xf32> to vector<8x32xf32>
    %68 = vector.shape_cast %65 : vector<8x1xf32> to vector<8x1xf32>
    %69 = vector.broadcast %68 : vector<8x1xf32> to vector<8x32xf32>
    %70 = arith.select %33, %67, %69 : vector<8x32xi1>, vector<8x32xf32>
    %71 = arith.divf %57, %70 : vector<8x32xf32>
    %c0_34 = arith.constant 0 : index
    %c0_35 = arith.constant 0 : index
    %72 = vector.load %arg10[%c0_34, %c0_35] : memref<8x32xf32, #tpu.memory_space<vmem>>, vector<8x32xf32>
    tpu.vector_store %arg10[%c0_34, %c0_35], %71 {strides = array<i32>} : memref<8x32xf32, #tpu.memory_space<vmem>>, vector<8x32xf32>,
    return
  }
  func.func @transform_0(%arg0: i32) -> (i32, i32) {
    %c0_i32 = arith.constant 0 : i32
    %c0_i32_0 = arith.constant 0 : i32
    return %arg0, %c0_i32 : i32, i32
  }
  func.func @transform_1(%arg0: i32) -> (i32, i32) {
    %c0_i32 = arith.constant 0 : i32
    %c0_i32_0 = arith.constant 0 : i32
    %c0_i32_1 = arith.constant 0 : i32
    return %c0_i32, %c0_i32_0 : i32, i32
  }
  func.func @transform_2(%arg0: i32) -> (i32, i32) {
    %c0_i32 = arith.constant 0 : i32
    %c0_i32_0 = arith.constant 0 : i32
    %c0_i32_1 = arith.constant 0 : i32
    return %c0_i32, %c0_i32_0 : i32, i32
  }
  func.func @transform_3(%arg0: i32) -> (i32, i32) {
    %c0_i32 = arith.constant 0 : i32
    %c0_i32_0 = arith.constant 0 : i32
    %c0_i32_1 = arith.constant 0 : i32
    return %c0_i32, %c0_i32_0 : i32, i32
  }
  func.func @transform_4(%arg0: i32) -> (i32, i32) {
    %c0_i32 = arith.constant 0 : i32
    %c0_i32_0 = arith.constant 0 : i32
    %c0_i32_1 = arith.constant 0 : i32
    return %c0_i32, %c0_i32_0 : i32, i32
  }
  func.func @transform_5(%arg0: i32) -> (i32, i32) {
    %c0_i32 = arith.constant 0 : i32
    %c0_i32_0 = arith.constant 0 : i32
    %c0_i32_1 = arith.constant 0 : i32
    return %c0_i32, %c0_i32_0 : i32, i32
  }
  func.func @transform_6(%arg0: i32) -> (i32, i32) {
    %c0_i32 = arith.constant 0 : i32
    %c0_i32_0 = arith.constant 0 : i32
    %c0_i32_1 = arith.constant 0 : i32
    return %c0_i32, %c0_i32_0 : i32, i32
  }
  func.func @transform_7(%arg0: i32) -> (i32, i32) {
    %c0_i32 = arith.constant 0 : i32
    %c0_i32_0 = arith.constant 0 : i32
    %c0_i32_1 = arith.constant 0 : i32
    return %c0_i32, %c0_i32_0 : i32, i32
  }
  func.func @transform_8(%arg0: i32) -> (i32, i32) {
    %c0_i32 = arith.constant 0 : i32
    %c0_i32_0 = arith.constant 0 : i32
    %c0_i32_1 = arith.constant 0 : i32
    return %c0_i32, %c0_i32_0 : i32, i32
  }
  func.func @transform_9(%arg0: i32) -> (i32, i32) {
    %c0_i32 = arith.constant 0 : i32
    %c0_i32_0 = arith.constant 0 : i32
    return %arg0, %c0_i32 : i32, i32
  }
}

</mosaic_0001>

<bundles_post_ra>
// kernel: tpu_custom_call.1
= control target key start
LH: loop header
LB: loop body
LE: loop exit
PB: predicated region body
PF: predicated region fallthrough
CT: control target
= control target key end

     0   :  { %14 = vsyncpa [#allocation3], 0  ;;  %s4229_s0 = inlined_call_operand.vmem [shape: f32[8,1000], index: 0, kind: input, shape index: {}]   ;;  %s4230_s1 = inlined_call_operand.hbm [shape: bf16[1000,512], index: 1, kind: input, shape index: {}]   ;;  %s4231_s2 = inlined_call_operand.vmem [shape: f32[1,512], index: 2, kind: input, shape index: {}]   ;;  %s4232_s3 = inlined_call_operand.hbm [shape: bf16[512,256], index: 3, kind: input, shape index: {}]   ;;  %s4233_s4 = inlined_call_operand.vmem [shape: f32[1,256], index: 4, kind: input, shape index: {}]   ;;  %s4234_s5 = inlined_call_operand.hbm [shape: bf16[256,256], index: 5, kind: input, shape index: {}]   ;;  %s4235_s6 = inlined_call_operand.vmem [shape: f32[1,256], index: 6, kind: input, shape index: {}]   ;;  %s4236_s7 = inlined_call_operand.vmem [shape: bf16[256,32], index: 7, kind: input, shape index: {}]   ;;  %s4237_s8 = inlined_call_operand.vmem [shape: f32[1,32], index: 8, kind: input, shape index: {}]   ;;  %s4238_s9 = inlined_call_operand.hbm [shape: f32[8,32], index: 9, kind: output, shape index: {}]  }
   0x1   :  { %15 = vsyncpa [#allocation6], 0 }
   0x2   :  { %16 = vsyncpa [#allocation4], 0  ;;  %s3987_s30 = smov [#allocation5]   ;;  %s3893_s13 = scalar_lea.hbm %s4232_s3, 8192 }
   0x3   :  { %s38_s10 = sshll.u32 %s3987_s30, 4  ;;  %p3894_p0 = scmp.ne.s32.totalorder %s4232_s3, %s3893_s13  ;;  %s39_s10 = int_to_ptr.vmem [resolvable:$true] %s38_s10 }
   0x4   :  { %p3897_p1 = scmp.lt.u32.totalorder %s3893_s13, %s4232_s3 }
   0x6   :  { %p3899_p2 = pnand %p3897_p1, %p3894_p0 }
   0x8   :  { %3902 = shalt.err (!%p3899_p2)
}
   0x9   :  { %s3903_s18 = scalar_lea.vmem %s39_s10, 8192  ;;  %p3908_p4 = scmp.lt.s32.totalorder %s39_s10, %s39_s10 }
   0xa   :  { %p3904_p3 = scmp.ne.s32.totalorder %s39_s10, %s3903_s18  ;;  %p3909_p5 = scmp.lt.s32.totalorder %s3903_s18, %s3903_s18 }
   0xc   :  { %p3910_p6 = por %p3909_p5, %p3908_p4 }
   0xe   :  { %p3911_p7 = pnand %p3910_p6, %p3904_p3 }
  0x10   :  { %3914 = shalt.err (!%p3911_p7)
}
  0x11   :  { %s3988_s19 = smov 128   ;;  %s3989_s20 = smov 8  }
  0x12   :  { %44 = dma.hbm_to_vmem [thread:$0]  %s4232_s3, 8192, %s39_s10, [#allocation6], %s3988_s19, %s3988_s19, %s3989_s20  }
  0x13   :  { %s3990_s23 = smov [#allocation2]   ;;  %s3915_s27 = scalar_lea.hbm %s4230_s1, 32000 }
  0x14   :  { %s24_s24 = sshll.u32 %s3990_s23, 4  ;;  %p3916_p8 = scmp.ne.s32.totalorder %s4230_s1, %s3915_s27  ;;  %s25_s24 = int_to_ptr.vmem [resolvable:$true] %s24_s24 }
  0x15   :  { %p3919_p9 = scmp.lt.u32.totalorder %s3915_s27, %s4230_s1 }
  0x17   :  { %p3921_p10 = pnand %p3919_p9, %p3916_p8 }
  0x19   :  { %3924 = shalt.err (!%p3921_p10)
}
  0x1a   :  { %s3925_s12 = scalar_lea.vmem %s25_s24, 32000  ;;  %p3930_p12 = scmp.lt.s32.totalorder %s25_s24, %s25_s24 }
  0x1b   :  { %p3926_p11 = scmp.ne.s32.totalorder %s25_s24, %s3925_s12  ;;  %p3931_p13 = scmp.lt.s32.totalorder %s3925_s12, %s3925_s12 }
  0x1d   :  { %p3932_p0 = por %p3931_p13, %p3930_p12 }
  0x1f   :  { %p3933_p1 = pnand %p3932_p0, %p3926_p11 }
  0x21   :  { %3936 = shalt.err (!%p3933_p1)
}
  0x22   :  { %s3991_s3 = smov 256   ;;  %s3992_s10 = smov 16  }
  0x23   :  { %30 = dma.hbm_to_vmem [thread:$0]  %s4230_s1, 32000, %s25_s24, [#allocation3], %s3991_s3, %s3991_s3, %s3992_s10  }
  0x24   :  { %s3993_s15 = smov [#allocation7]   ;;  %s3937_s21 = scalar_lea.hbm %s4234_s5, 4096 }
  0x25   :  { %s52_s16 = sshll.u32 %s3993_s15, 4  ;;  %p3938_p2 = scmp.ne.s32.totalorder %s4234_s5, %s3937_s21  ;;  %s53_s16 = int_to_ptr.vmem [resolvable:$true] %s52_s16 }
  0x26   :  { %p3941_p3 = scmp.lt.u32.totalorder %s3937_s21, %s4234_s5 }
  0x28   :  { %p3943_p4 = pnand %p3941_p3, %p3938_p2 }
  0x2a   :  { %3946 = shalt.err (!%p3943_p4)
}
  0x2b   :  { %s3947_s27 = scalar_lea.vmem %s53_s16, 4096  ;;  %p3952_p6 = scmp.lt.s32.totalorder %s53_s16, %s53_s16 }
  0x2c   :  { %p3948_p5 = scmp.ne.s32.totalorder %s53_s16, %s3947_s27  ;;  %p3953_p7 = scmp.lt.s32.totalorder %s3947_s27, %s3947_s27 }
  0x2e   :  { %p3954_p8 = por %p3953_p7, %p3952_p6 }
  0x30   :  { %p3955_p9 = pnand %p3954_p8, %p3948_p5 }
  0x32   :  { %3958 = shalt.err (!%p3955_p9)
}
  0x33   :  { %58 = dma.hbm_to_vmem [thread:$0]  %s4234_s5, 4096, %s53_s16, [#allocation6], %s3988_s19, %s3988_s19, %s3989_s20  }
  0x34   :  { %3981 = dma.done.wait [#allocation3], 32000  }
  0x35   :  { %3982 = vsyncadd [#allocation3], 4294935296 }
  0x36   :  { %3983 = dma.done.wait [#allocation6], 12288  }
  0x37   :  { %3984 = vsyncadd [#allocation6], 4294955008  ;;  %v3353_v0 = vld [vmem:[#allocation2 + $0x4] ss:$16 sps:$4 sm:$0xff]   ;;  %v3355_v1 = vld [vmem:[#allocation2 + $0xc] ss:$16 sps:$4 sm:$0xff]  }
  0x38   :  { %1630 = vmatprep.subr.bf16.mxu0 %v3353_v0  ;;  %v3357_v2 = vld [vmem:[#allocation2] ss:$16 sps:$4 sm:$0xff]   ;;  %v3358_v3 = vld [vmem:[#allocation2 + $0x8] ss:$16 sps:$4 sm:$0xff]   ;;  %1794 = vmatprep.subr.bf16.mxu1 %v3355_v1  ;;  %v3359_v4 = vld [vmem:[#allocation2 + $0x24] ss:$16 sps:$4 sm:$0xff]  }
  0x39   :  { %1631 = vmatpush1.bf16.msra.mxu0 %v3357_v2  ;;  %1795 = vmatpush1.bf16.msra.mxu1 %v3358_v3  ;;  %v3361_v5 = vld [vmem:[#allocation2 + $0x2c] ss:$16 sps:$4 sm:$0xff]   ;;  %v3363_v6 = vld [vmem:[#allocation2 + $0x20] ss:$16 sps:$4 sm:$0xff]   ;;  %v3364_v7 = vld [vmem:[#allocation2 + $0x28] ss:$16 sps:$4 sm:$0xff]  }
  0x3a   :  { %1632 = vmatprep.subr.bf16.mxu0 %v3359_v4  ;;  %1796 = vmatprep.subr.bf16.mxu1 %v3361_v5  ;;  %v3365_v8 = vld [vmem:[#allocation2 + $0x44] ss:$16 sps:$4 sm:$0xff]   ;;  %v3367_v9 = vld [vmem:[#allocation2 + $0x4c] ss:$16 sps:$4 sm:$0xff]   ;;  %v3369_v10 = vld [vmem:[#allocation2 + $0x40] ss:$16 sps:$4 sm:$0xff]  }
  0x3b   :  { %v3370_v11 = vld [vmem:[#allocation2 + $0x48] ss:$16 sps:$4 sm:$0xff]   ;;  %v3371_v12 = vld [vmem:[#allocation2 + $0x64] ss:$16 sps:$4 sm:$0xff]   ;;  %v3373_v13 = vld [vmem:[#allocation2 + $0x6c] ss:$16 sps:$4 sm:$0xff]  }
  0x3c   :  { %v3375_v14 = vld [vmem:[#allocation2 + $0x60] ss:$16 sps:$4 sm:$0xff]   ;;  %v3376_v15 = vld [vmem:[#allocation2 + $0x68] ss:$16 sps:$4 sm:$0xff]   ;;  %v3377_v16 = vld [vmem:[#allocation2 + $0x84] ss:$16 sps:$4 sm:$0xff]  }
  0x3d   :  { %1633 = vmatpush1.bf16.msra.mxu0 %v3363_v6  ;;  %1797 = vmatpush1.bf16.msra.mxu1 %v3364_v7  ;;  %v3379_v17 = vld [vmem:[#allocation2 + $0x8c] ss:$16 sps:$4 sm:$0xff]   ;;  %v3381_v18 = vld [vmem:[#allocation2 + $0x80] ss:$16 sps:$4 sm:$0xff]   ;;  %v3382_v19 = vld [vmem:[#allocation2 + $0x88] ss:$16 sps:$4 sm:$0xff]  }
  0x3e   :  { %1634 = vmatprep.subr.bf16.mxu0 %v3365_v8  ;;  %1798 = vmatprep.subr.bf16.mxu1 %v3367_v9  ;;  %v3383_v20 = vld [vmem:[#allocation2 + $0xa4] ss:$16 sps:$4 sm:$0xff]   ;;  %v3385_v21 = vld [vmem:[#allocation2 + $0xac] ss:$16 sps:$4 sm:$0xff]   ;;  %v3387_v22 = vld [vmem:[#allocation2 + $0xa0] ss:$16 sps:$4 sm:$0xff]  }
  0x3f   :  { %v3388_v23 = vld [vmem:[#allocation2 + $0xa8] ss:$16 sps:$4 sm:$0xff]   ;;  %v3389_v24 = vld [vmem:[#allocation2 + $0xc4] ss:$16 sps:$4 sm:$0xff]   ;;  %v3391_v25 = vld [vmem:[#allocation2 + $0xcc] ss:$16 sps:$4 sm:$0xff]  }
  0x40   :  { %v3393_v26 = vld [vmem:[#allocation2 + $0xc0] ss:$16 sps:$4 sm:$0xff]   ;;  %v3394_v27 = vld [vmem:[#allocation2 + $0xc8] ss:$16 sps:$4 sm:$0xff]   ;;  %v3395_v28 = vld [vmem:[#allocation2 + $0xe4] ss:$16 sps:$4 sm:$0xff]  }
  0x41   :  { %1635 = vmatpush1.bf16.msra.mxu0 %v3369_v10  ;;  %1799 = vmatpush1.bf16.msra.mxu1 %v3370_v11  ;;  %v3397_v29 = vld [vmem:[#allocation2 + $0xec] ss:$16 sps:$4 sm:$0xff]   ;;  %v3399_v30 = vld [vmem:[#allocation2 + $0xe0] ss:$16 sps:$4 sm:$0xff]   ;;  %v3400_v31 = vld [vmem:[#allocation2 + $0xe8] ss:$16 sps:$4 sm:$0xff]  }
  0x42   :  { %1636 = vmatprep.subr.bf16.mxu0 %v3371_v12  ;;  %1800 = vmatprep.subr.bf16.mxu1 %v3373_v13  ;;  %v3401_v32 = vld [vmem:[#allocation2 + $0x104] ss:$16 sps:$4 sm:$0xff]   ;;  %v3403_v33 = vld [vmem:[#allocation2 + $0x10c] ss:$16 sps:$4 sm:$0xff]   ;;  %v3405_v34 = vld [vmem:[#allocation2 + $0x100] ss:$16 sps:$4 sm:$0xff]  }
  0x43   :  { %v3406_v35 = vld [vmem:[#allocation2 + $0x108] ss:$16 sps:$4 sm:$0xff]   ;;  %v3407_v36 = vld [vmem:[#allocation2 + $0x124] ss:$16 sps:$4 sm:$0xff]   ;;  %v3409_v37 = vld [vmem:[#allocation2 + $0x12c] ss:$16 sps:$4 sm:$0xff]  }
  0x44   :  { %v3411_v38 = vld [vmem:[#allocation2 + $0x120] ss:$16 sps:$4 sm:$0xff]   ;;  %v3412_v39 = vld [vmem:[#allocation2 + $0x128] ss:$16 sps:$4 sm:$0xff]   ;;  %v3413_v40 = vld [vmem:[#allocation2 + $0x144] ss:$16 sps:$4 sm:$0xff]  }
  0x45   :  { %1637 = vmatpush1.bf16.msra.mxu0 %v3375_v14  ;;  %1801 = vmatpush1.bf16.msra.mxu1 %v3376_v15  ;;  %v3415_v41 = vld [vmem:[#allocation2 + $0x14c] ss:$16 sps:$4 sm:$0xff]   ;;  %v3417_v42 = vld [vmem:[#allocation2 + $0x140] ss:$16 sps:$4 sm:$0xff]   ;;  %v3418_v43 = vld [vmem:[#allocation2 + $0x148] ss:$16 sps:$4 sm:$0xff]  }
  0x46   :  { %1638 = vmatprep.subr.bf16.mxu0 %v3377_v16  ;;  %1802 = vmatprep.subr.bf16.mxu1 %v3379_v17  ;;  %v3419_v44 = vld [vmem:[#allocation2 + $0x164] ss:$16 sps:$4 sm:$0xff]   ;;  %v3421_v45 = vld [vmem:[#allocation2 + $0x16c] ss:$16 sps:$4 sm:$0xff]   ;;  %v3423_v47 = vld [vmem:[#allocation2 + $0x160] ss:$16 sps:$4 sm:$0xff]  }
  0x47   :  { %v76_v46 = vld [vmem:[%s4229_s0 + $0x8] sm:$0xff]  ;;  %v3425_v50 = vld [vmem:[#allocation2 + $0x184] ss:$16 sps:$4 sm:$0xff]   ;;  %v3429_v52 = vld [vmem:[#allocation2 + $0x180] ss:$16 sps:$4 sm:$0xff]   ;;  %vm1613_vm0 = vcmask 850944  }
  0x48   :  { %v84_v48 = vpack.c.bf16 %v76_v46, %v76_v46  ;;  %v3424_v49 = vld [vmem:[#allocation2 + $0x168] ss:$16 sps:$4 sm:$0xff]   ;;  %v3427_v51 = vld [vmem:[#allocation2 + $0x18c] ss:$16 sps:$4 sm:$0xff]   ;;  %v3431_v54 = vld [vmem:[#allocation2 + $0x1a4] ss:$16 sps:$4 sm:$0xff]  }
  0x49   :  { %1639 = vmatpush1.bf16.msra.mxu0 %v3381_v18  ;;  %1803 = vmatpush1.bf16.msra.mxu1 %v3382_v19  ;;  %v3430_v53 = vld [vmem:[#allocation2 + $0x188] ss:$16 sps:$4 sm:$0xff]   ;;  %v3433_v55 = vld [vmem:[#allocation2 + $0x1ac] ss:$16 sps:$4 sm:$0xff]   ;;  %v3435_v56 = vld [vmem:[#allocation2 + $0x1a0] ss:$16 sps:$4 sm:$0xff]  }
  0x4a   :  { %1640 = vmatprep.subr.bf16.mxu0 %v3383_v20  ;;  %1804 = vmatprep.subr.bf16.mxu1 %v3385_v21  ;;  %v3436_v57 = vld [vmem:[#allocation2 + $0x1a8] ss:$16 sps:$4 sm:$0xff]   ;;  %v3437_v58 = vld [vmem:[#allocation2 + $0x1c4] ss:$16 sps:$4 sm:$0xff]   ;;  %v3439_v59 = vld [vmem:[#allocation2 + $0x1cc] ss:$16 sps:$4 sm:$0xff]  }
  0x4b   :  { %1662 = vmatprep.mubr.bf16.mxu0 %v84_v48  ;;  %1826 = vmatprep.mubr.bf16.mxu1 %v84_v48  ;;  %v3441_v60 = vld [vmem:[#allocation2 + $0x1c0] ss:$16 sps:$4 sm:$0xff]   ;;  %v3442_v61 = vld [vmem:[#allocation2 + $0x1c8] ss:$16 sps:$4 sm:$0xff]   ;;  %v3443_v62 = vld [vmem:[#allocation2 + $0x1e4] ss:$16 sps:$4 sm:$0xff]  }
  0x4c   :  { %v3445_v63 = vld [vmem:[#allocation2 + $0x1ec] ss:$16 sps:$4 sm:$0xff]   ;;  %v3447_v0 = vld [vmem:[#allocation2 + $0x1e0] ss:$16 sps:$4 sm:$0xff]   ;;  %v3448_v1 = vld [vmem:[#allocation2 + $0x1e8] ss:$16 sps:$4 sm:$0xff]  }
  0x4d   :  { %1641 = vmatpush1.bf16.msra.mxu0 %v3387_v22  ;;  %1805 = vmatpush1.bf16.msra.mxu1 %v3388_v23  ;;  %v75_v2 = vld [vmem:[%s4229_s0] sm:$0xff]  ;;  %v3454_v4 = vld [vmem:[#allocation2 + $0x20c] ss:$16 sps:$4 sm:$0xff]   ;;  %v3452_v7 = vld [vmem:[#allocation2 + $0x208] ss:$16 sps:$4 sm:$0xff]   ;;  %vm1617_vm1 = vcmask 1043456  }
  0x4e   :  { %1642 = vmatprep.subr.bf16.mxu0 %v3389_v24  ;;  %1806 = vmatprep.subr.bf16.mxu1 %v3391_v25  ;;  %v3451_v3 = vld [vmem:[#allocation2 + $0x204] ss:$16 sps:$4 sm:$0xff]   ;;  %v83_v5 = vpack.c.bf16 %v75_v2, %v75_v2  ;;  %v3449_v6 = vld [vmem:[#allocation2 + $0x200] ss:$16 sps:$4 sm:$0xff]   ;;  %v3460_v9 = vld [vmem:[#allocation2 + $0x22c] ss:$16 sps:$4 sm:$0xff]  }
  0x4f   :  { %v3457_v8 = vld [vmem:[#allocation2 + $0x224] ss:$16 sps:$4 sm:$0xff]   ;;  %v3455_v10 = vld [vmem:[#allocation2 + $0x220] ss:$16 sps:$4 sm:$0xff]   ;;  %v3458_v11 = vld [vmem:[#allocation2 + $0x228] ss:$16 sps:$4 sm:$0xff]  }
  0x50   :  { %v3463_v12 = vld [vmem:[#allocation2 + $0x244] ss:$16 sps:$4 sm:$0xff]   ;;  %v3466_v13 = vld [vmem:[#allocation2 + $0x24c] ss:$16 sps:$4 sm:$0xff]   ;;  %v3461_v14 = vld [vmem:[#allocation2 + $0x240] ss:$16 sps:$4 sm:$0xff]  }
  0x51   :  { %1643 = vmatpush1.bf16.msra.mxu0 %v3393_v26  ;;  %1807 = vmatpush1.bf16.msra.mxu1 %v3394_v27  ;;  %v3464_v15 = vld [vmem:[#allocation2 + $0x248] ss:$16 sps:$4 sm:$0xff]   ;;  %v3469_v16 = vld [vmem:[#allocation2 + $0x264] ss:$16 sps:$4 sm:$0xff]   ;;  %v3472_v17 = vld [vmem:[#allocation2 + $0x26c] ss:$16 sps:$4 sm:$0xff]  }
  0x52   :  { %1644 = vmatprep.subr.bf16.mxu0 %v3395_v28  ;;  %1808 = vmatprep.subr.bf16.mxu1 %v3397_v29  ;;  %v3467_v18 = vld [vmem:[#allocation2 + $0x260] ss:$16 sps:$4 sm:$0xff]   ;;  %v3470_v19 = vld [vmem:[#allocation2 + $0x268] ss:$16 sps:$4 sm:$0xff]   ;;  %v3475_v20 = vld [vmem:[#allocation2 + $0x284] ss:$16 sps:$4 sm:$0xff]  }
  0x53   :  { %v3478_v21 = vld [vmem:[#allocation2 + $0x28c] ss:$16 sps:$4 sm:$0xff]   ;;  %v3473_v22 = vld [vmem:[#allocation2 + $0x280] ss:$16 sps:$4 sm:$0xff]   ;;  %v3476_v23 = vld [vmem:[#allocation2 + $0x288] ss:$16 sps:$4 sm:$0xff]  }
  0x54   :  { %v3481_v24 = vld [vmem:[#allocation2 + $0x2a4] ss:$16 sps:$4 sm:$0xff]   ;;  %v3484_v25 = vld [vmem:[#allocation2 + $0x2ac] ss:$16 sps:$4 sm:$0xff]   ;;  %v3479_v26 = vld [vmem:[#allocation2 + $0x2a0] ss:$16 sps:$4 sm:$0xff]  }
  0x55   :  { %1645 = vmatpush1.bf16.msra.mxu0 %v3399_v30  ;;  %1809 = vmatpush1.bf16.msra.mxu1 %v3400_v31  ;;  %v3482_v27 = vld [vmem:[#allocation2 + $0x2a8] ss:$16 sps:$4 sm:$0xff]   ;;  %v3487_v28 = vld [vmem:[#allocation2 + $0x2c4] ss:$16 sps:$4 sm:$0xff]   ;;  %v3490_v29 = vld [vmem:[#allocation2 + $0x2cc] ss:$16 sps:$4 sm:$0xff]  }
  0x56   :  { %1646 = vmatprep.subr.bf16.mxu0 %v3401_v32  ;;  %1810 = vmatprep.subr.bf16.mxu1 %v3403_v33  ;;  %v78_v30 = vld [vmem:[%s4229_s0 + $0x18] sm:$0xff]  ;;  %v3485_v31 = vld [vmem:[#allocation2 + $0x2c0] ss:$16 sps:$4 sm:$0xff]   ;;  %v3511_v46 = vld [vmem:[#allocation2 + $0x344] ss:$16 sps:$4 sm:$0xff]   ;;  %vm2879_vm5 = vcmask 261120  }
  0x57   :  { %v86_v32 = vpack.c.bf16 %v78_v30, %v78_v30  ;;  %v3488_v33 = vld [vmem:[#allocation2 + $0x2c8] ss:$16 sps:$4 sm:$0xff]   ;;  %v3509_v48 = vld [vmem:[#allocation2 + $0x340] ss:$16 sps:$4 sm:$0xff]   ;;  %v3541_v2 = vld [vmem:[#allocation2 + $0x3e4] ss:$16 sps:$4 sm:$0xff]  }
  0x58   :  { %v3577_v30 = vld [vmem:[#allocation2 + $0x4a4] ss:$16 sps:$4 sm:$0xff]  }
  0x59   :  { %1647 = vmatpush1.bf16.msra.mxu0 %v3405_v34  ;;  %1811 = vmatpush1.bf16.msra.mxu1 %v3406_v35  ;;  %v3493_v34 = vld [vmem:[#allocation2 + $0x2e4] ss:$16 sps:$4 sm:$0xff]   ;;  %v3496_v35 = vld [vmem:[#allocation2 + $0x2ec] ss:$16 sps:$4 sm:$0xff]  }
  0x5a   :  { %1648 = vmatprep.subr.bf16.mxu0 %v3407_v36  ;;  %1812 = vmatprep.subr.bf16.mxu1 %v3409_v37  ;;  %v3491_v36 = vld [vmem:[#allocation2 + $0x2e0] ss:$16 sps:$4 sm:$0xff]   ;;  %v3494_v37 = vld [vmem:[#allocation2 + $0x2e8] ss:$16 sps:$4 sm:$0xff]  }
  0x5d   :  { %1649 = vmatpush1.bf16.msra.mxu0 %v3411_v38  ;;  %1813 = vmatpush1.bf16.msra.mxu1 %v3412_v39  ;;  %v3499_v38 = vld [vmem:[#allocation2 + $0x304] ss:$16 sps:$4 sm:$0xff]   ;;  %v3502_v39 = vld [vmem:[#allocation2 + $0x30c] ss:$16 sps:$4 sm:$0xff]  }
  0x5e   :  { %1650 = vmatprep.subr.bf16.mxu0 %v3413_v40  ;;  %1814 = vmatprep.subr.bf16.mxu1 %v3415_v41  ;;  %v3497_v40 = vld [vmem:[#allocation2 + $0x300] ss:$16 sps:$4 sm:$0xff]   ;;  %v3500_v41 = vld [vmem:[#allocation2 + $0x308] ss:$16 sps:$4 sm:$0xff]  }
  0x61   :  { %1651 = vmatpush1.bf16.msra.mxu0 %v3417_v42  ;;  %1815 = vmatpush1.bf16.msra.mxu1 %v3418_v43  ;;  %v3505_v42 = vld [vmem:[#allocation2 + $0x324] ss:$16 sps:$4 sm:$0xff]   ;;  %v3508_v43 = vld [vmem:[#allocation2 + $0x32c] ss:$16 sps:$4 sm:$0xff]  }
  0x62   :  { %1652 = vmatprep.subr.bf16.mxu0 %v3419_v44  ;;  %1816 = vmatprep.subr.bf16.mxu1 %v3421_v45  ;;  %v3503_v44 = vld [vmem:[#allocation2 + $0x320] ss:$16 sps:$4 sm:$0xff]   ;;  %v3506_v45 = vld [vmem:[#allocation2 + $0x328] ss:$16 sps:$4 sm:$0xff]  }
  0x65   :  { %1653 = vmatpush1.bf16.msra.mxu0 %v3423_v47  ;;  %1817 = vmatpush1.bf16.msra.mxu1 %v3424_v49  ;;  %v3514_v47 = vld [vmem:[#allocation2 + $0x34c] ss:$16 sps:$4 sm:$0xff]   ;;  %v3512_v49 = vld [vmem:[#allocation2 + $0x348] ss:$16 sps:$4 sm:$0xff]  }
  0x66   :  { %1654 = vmatprep.subr.bf16.mxu0 %v3425_v50  ;;  %1818 = vmatprep.subr.bf16.mxu1 %v3427_v51  ;;  %v3517_v50 = vld [vmem:[#allocation2 + $0x364] ss:$16 sps:$4 sm:$0xff]   ;;  %v3520_v51 = vld [vmem:[#allocation2 + $0x36c] ss:$16 sps:$4 sm:$0xff]  }
  0x69   :  { %1655 = vmatpush1.bf16.msra.mxu0 %v3429_v52  ;;  %1819 = vmatpush1.bf16.msra.mxu1 %v3430_v53  ;;  %v3515_v52 = vld [vmem:[#allocation2 + $0x360] ss:$16 sps:$4 sm:$0xff]   ;;  %v3518_v53 = vld [vmem:[#allocation2 + $0x368] ss:$16 sps:$4 sm:$0xff]  }
  0x6a   :  { %1656 = vmatprep.subr.bf16.mxu0 %v3431_v54  ;;  %1820 = vmatprep.subr.bf16.mxu1 %v3433_v55  ;;  %v3523_v54 = vld [vmem:[#allocation2 + $0x384] ss:$16 sps:$4 sm:$0xff]   ;;  %v3526_v55 = vld [vmem:[#allocation2 + $0x38c] ss:$16 sps:$4 sm:$0xff]  }
  0x6d   :  { %1657 = vmatpush1.bf16.msra.mxu0 %v3435_v56  ;;  %1821 = vmatpush1.bf16.msra.mxu1 %v3436_v57  ;;  %v3521_v56 = vld [vmem:[#allocation2 + $0x380] ss:$16 sps:$4 sm:$0xff]   ;;  %v3524_v57 = vld [vmem:[#allocation2 + $0x388] ss:$16 sps:$4 sm:$0xff]  }
  0x6e   :  { %1658 = vmatprep.subr.bf16.mxu0 %v3437_v58  ;;  %1822 = vmatprep.subr.bf16.mxu1 %v3439_v59  ;;  %v3529_v58 = vld [vmem:[#allocation2 + $0x3a4] ss:$16 sps:$4 sm:$0xff]   ;;  %v3532_v59 = vld [vmem:[#allocation2 + $0x3ac] ss:$16 sps:$4 sm:$0xff]  }
  0x71   :  { %1659 = vmatpush1.bf16.msra.mxu0 %v3441_v60  ;;  %1823 = vmatpush1.bf16.msra.mxu1 %v3442_v61  ;;  %v3527_v60 = vld [vmem:[#allocation2 + $0x3a0] ss:$16 sps:$4 sm:$0xff]   ;;  %v3530_v61 = vld [vmem:[#allocation2 + $0x3a8] ss:$16 sps:$4 sm:$0xff]  }
  0x72   :  { %1660 = vmatprep.subr.bf16.mxu0 %v3443_v62  ;;  %1824 = vmatprep.subr.bf16.mxu1 %v3445_v63  ;;  %v3535_v62 = vld [vmem:[#allocation2 + $0x3c4] ss:$16 sps:$4 sm:$0xff]   ;;  %v3538_v63 = vld [vmem:[#allocation2 + $0x3cc] ss:$16 sps:$4 sm:$0xff]  }
  0x75   :  { %1661 = vmatpush1.bf16.msra.mxu0 %v3447_v0  ;;  %1825 = vmatpush1.bf16.msra.mxu1 %v3448_v1  ;;  %v3533_v0 = vld [vmem:[#allocation2 + $0x3c0] ss:$16 sps:$4 sm:$0xff]   ;;  %v3536_v1 = vld [vmem:[#allocation2 + $0x3c8] ss:$16 sps:$4 sm:$0xff]  }
  0x76   :  { %1671 = vmatprep.subr.bf16.mxu0 %v3451_v3  ;;  %1835 = vmatprep.subr.bf16.mxu1 %v3454_v4  ;;  %v3544_v3 = vld [vmem:[#allocation2 + $0x3ec] ss:$16 sps:$4 sm:$0xff]   ;;  %v3539_v4 = vld [vmem:[#allocation2 + $0x3e0] ss:$16 sps:$4 sm:$0xff]  }
  0x78   :  { %1663 = vmatmul.mubr.bf16.vlgmr.msra.gmra.mrb[0].mxu0 %v83_v5  ;;  %1827 = vmatmul.mubr.bf16.vlgmr.msra.gmra.mrb[0].mxu1 %v83_v5  ;;  %v3542_v5 = vld [vmem:[#allocation2 + $0x3e8] ss:$16 sps:$4 sm:$0xff]  }
  0x79   :  { %1672 = vmatpush1.bf16.msra.mxu0 %v3449_v6  ;;  %1836 = vmatpush1.bf16.msra.mxu1 %v3452_v7  ;;  %v3547_v6 = vld [vmem:[#allocation2 + $0x404] ss:$16 sps:$4 sm:$0xff]  }
  0x7a   :  { %1673 = vmatprep.subr.bf16.mxu0 %v3457_v8  ;;  %1837 = vmatprep.subr.bf16.mxu1 %v3460_v9  ;;  %v77_v7 = vld [vmem:[%s4229_s0 + $0x10] sm:$0xff]  ;;  %v3550_v8 = vld [vmem:[#allocation2 + $0x40c] ss:$16 sps:$4 sm:$0xff]  }
  0x7b   :  { %1703 = vmatprep.mubr.bf16.mxu0 %v86_v32  ;;  %1867 = vmatprep.mubr.bf16.mxu1 %v86_v32  ;;  %v3545_v9 = vld [vmem:[#allocation2 + $0x400] ss:$16 sps:$4 sm:$0xff]  }
  0x7c   :  { %v3575_v32 = vld [vmem:[#allocation2 + $0x4a0] ss:$16 sps:$4 sm:$0xff]  }
  0x7d   :  { %1674 = vmatpush1.bf16.msra.mxu0 %v3455_v10  ;;  %1838 = vmatpush1.bf16.msra.mxu1 %v3458_v11  ;;  %v3548_v10 = vld [vmem:[#allocation2 + $0x408] ss:$16 sps:$4 sm:$0xff]   ;;  %v85_v11 = vpack.c.bf16 %v77_v7, %v77_v7  ;;  %v3640_v7 = vld [vmem:[#allocation2 + $0x5ec] ss:$16 sps:$4 sm:$0xff]  }
  0x7e   :  { %1675 = vmatprep.subr.bf16.mxu0 %v3463_v12  ;;  %1839 = vmatprep.subr.bf16.mxu1 %v3466_v13  ;;  %v3553_v12 = vld [vmem:[#allocation2 + $0x424] ss:$16 sps:$4 sm:$0xff]   ;;  %v3556_v13 = vld [vmem:[#allocation2 + $0x42c] ss:$16 sps:$4 sm:$0xff]  }
  0x81   :  { %1676 = vmatpush1.bf16.msra.mxu0 %v3461_v14  ;;  %1840 = vmatpush1.bf16.msra.mxu1 %v3464_v15  ;;  %v80_v14 = vld [vmem:[%s4229_s0 + $0x28] sm:$0xff] }
  0x82   :  { %1677 = vmatprep.subr.bf16.mxu0 %v3469_v16  ;;  %1841 = vmatprep.subr.bf16.mxu1 %v3472_v17  ;;  %v88_v15 = vpack.c.bf16 %v80_v14, %v80_v14  ;;  %v3551_v16 = vld [vmem:[#allocation2 + $0x420] ss:$16 sps:$4 sm:$0xff]   ;;  %v3554_v17 = vld [vmem:[#allocation2 + $0x428] ss:$16 sps:$4 sm:$0xff]  }
  0x83   :  { %v3641_v14 = vld [vmem:[#allocation2 + $0x600] ss:$16 sps:$4 sm:$0xff]  }
  0x85   :  { %1678 = vmatpush1.bf16.msra.mxu0 %v3467_v18  ;;  %1842 = vmatpush1.bf16.msra.mxu1 %v3470_v19  ;;  %v3559_v18 = vld [vmem:[#allocation2 + $0x444] ss:$16 sps:$4 sm:$0xff]   ;;  %v3562_v19 = vld [vmem:[#allocation2 + $0x44c] ss:$16 sps:$4 sm:$0xff]  }
  0x86   :  { %1679 = vmatprep.subr.bf16.mxu0 %v3475_v20  ;;  %1843 = vmatprep.subr.bf16.mxu1 %v3478_v21  ;;  %v3557_v20 = vld [vmem:[#allocation2 + $0x440] ss:$16 sps:$4 sm:$0xff]   ;;  %v3560_v21 = vld [vmem:[#allocation2 + $0x448] ss:$16 sps:$4 sm:$0xff]  }
  0x89   :  { %1680 = vmatpush1.bf16.msra.mxu0 %v3473_v22  ;;  %1844 = vmatpush1.bf16.msra.mxu1 %v3476_v23  ;;  %v3565_v22 = vld [vmem:[#allocation2 + $0x464] ss:$16 sps:$4 sm:$0xff]   ;;  %v3568_v23 = vld [vmem:[#allocation2 + $0x46c] ss:$16 sps:$4 sm:$0xff]  }
  0x8a   :  { %1681 = vmatprep.subr.bf16.mxu0 %v3481_v24  ;;  %1845 = vmatprep.subr.bf16.mxu1 %v3484_v25  ;;  %v3563_v24 = vld [vmem:[#allocation2 + $0x460] ss:$16 sps:$4 sm:$0xff]   ;;  %v3566_v25 = vld [vmem:[#allocation2 + $0x468] ss:$16 sps:$4 sm:$0xff]  }
  0x8d   :  { %1682 = vmatpush1.bf16.msra.mxu0 %v3479_v26  ;;  %1846 = vmatpush1.bf16.msra.mxu1 %v3482_v27  ;;  %v3571_v26 = vld [vmem:[#allocation2 + $0x484] ss:$16 sps:$4 sm:$0xff]   ;;  %v3574_v27 = vld [vmem:[#allocation2 + $0x48c] ss:$16 sps:$4 sm:$0xff]  }
  0x8e   :  { %1683 = vmatprep.subr.bf16.mxu0 %v3487_v28  ;;  %1847 = vmatprep.subr.bf16.mxu1 %v3490_v29  ;;  %v3569_v28 = vld [vmem:[#allocation2 + $0x480] ss:$16 sps:$4 sm:$0xff]   ;;  %v3572_v29 = vld [vmem:[#allocation2 + $0x488] ss:$16 sps:$4 sm:$0xff]  }
  0x91   :  { %1684 = vmatpush1.bf16.msra.mxu0 %v3485_v31  ;;  %1848 = vmatpush1.bf16.msra.mxu1 %v3488_v33  ;;  %v3580_v31 = vld [vmem:[#allocation2 + $0x4ac] ss:$16 sps:$4 sm:$0xff]   ;;  %v3578_v33 = vld [vmem:[#allocation2 + $0x4a8] ss:$16 sps:$4 sm:$0xff]  }
  0x92   :  { %1685 = vmatprep.subr.bf16.mxu0 %v3493_v34  ;;  %1849 = vmatprep.subr.bf16.mxu1 %v3496_v35  ;;  %v3583_v34 = vld [vmem:[#allocation2 + $0x4c4] ss:$16 sps:$4 sm:$0xff]   ;;  %v3586_v35 = vld [vmem:[#allocation2 + $0x4cc] ss:$16 sps:$4 sm:$0xff]  }
  0x95   :  { %1686 = vmatpush1.bf16.msra.mxu0 %v3491_v36  ;;  %1850 = vmatpush1.bf16.msra.mxu1 %v3494_v37  ;;  %v3581_v36 = vld [vmem:[#allocation2 + $0x4c0] ss:$16 sps:$4 sm:$0xff]   ;;  %v3584_v37 = vld [vmem:[#allocation2 + $0x4c8] ss:$16 sps:$4 sm:$0xff]  }
  0x96   :  { %1687 = vmatprep.subr.bf16.mxu0 %v3499_v38  ;;  %1851 = vmatprep.subr.bf16.mxu1 %v3502_v39  ;;  %v3589_v38 = vld [vmem:[#allocation2 + $0x4e4] ss:$16 sps:$4 sm:$0xff]   ;;  %v3592_v39 = vld [vmem:[#allocation2 + $0x4ec] ss:$16 sps:$4 sm:$0xff]  }
  0x99   :  { %1688 = vmatpush1.bf16.msra.mxu0 %v3497_v40  ;;  %1852 = vmatpush1.bf16.msra.mxu1 %v3500_v41  ;;  %v3587_v40 = vld [vmem:[#allocation2 + $0x4e0] ss:$16 sps:$4 sm:$0xff]   ;;  %v3590_v41 = vld [vmem:[#allocation2 + $0x4e8] ss:$16 sps:$4 sm:$0xff]  }
  0x9a   :  { %1689 = vmatprep.subr.bf16.mxu0 %v3505_v42  ;;  %1853 = vmatprep.subr.bf16.mxu1 %v3508_v43  ;;  %v3595_v42 = vld [vmem:[#allocation2 + $0x504] ss:$16 sps:$4 sm:$0xff]   ;;  %v3598_v43 = vld [vmem:[#allocation2 + $0x50c] ss:$16 sps:$4 sm:$0xff]  }
  0x9d   :  { %1690 = vmatpush1.bf16.msra.mxu0 %v3503_v44  ;;  %1854 = vmatpush1.bf16.msra.mxu1 %v3506_v45  ;;  %v3593_v44 = vld [vmem:[#allocation2 + $0x500] ss:$16 sps:$4 sm:$0xff]   ;;  %v3596_v45 = vld [vmem:[#allocation2 + $0x508] ss:$16 sps:$4 sm:$0xff]  }
  0x9e   :  { %1691 = vmatprep.subr.bf16.mxu0 %v3511_v46  ;;  %1855 = vmatprep.subr.bf16.mxu1 %v3514_v47  ;;  %v3601_v46 = vld [vmem:[#allocation2 + $0x524] ss:$16 sps:$4 sm:$0xff]   ;;  %v3604_v47 = vld [vmem:[#allocation2 + $0x52c] ss:$16 sps:$4 sm:$0xff]  }
  0xa1   :  { %1692 = vmatpush1.bf16.msra.mxu0 %v3509_v48  ;;  %1856 = vmatpush1.bf16.msra.mxu1 %v3512_v49  ;;  %v3599_v48 = vld [vmem:[#allocation2 + $0x520] ss:$16 sps:$4 sm:$0xff]   ;;  %v3602_v49 = vld [vmem:[#allocation2 + $0x528] ss:$16 sps:$4 sm:$0xff]  }
  0xa2   :  { %1693 = vmatprep.subr.bf16.mxu0 %v3517_v50  ;;  %1857 = vmatprep.subr.bf16.mxu1 %v3520_v51  ;;  %v3607_v50 = vld [vmem:[#allocation2 + $0x544] ss:$16 sps:$4 sm:$0xff]   ;;  %v3610_v51 = vld [vmem:[#allocation2 + $0x54c] ss:$16 sps:$4 sm:$0xff]  }
  0xa5   :  { %1694 = vmatpush1.bf16.msra.mxu0 %v3515_v52  ;;  %1858 = vmatpush1.bf16.msra.mxu1 %v3518_v53  ;;  %v3605_v52 = vld [vmem:[#allocation2 + $0x540] ss:$16 sps:$4 sm:$0xff]   ;;  %v3608_v53 = vld [vmem:[#allocation2 + $0x548] ss:$16 sps:$4 sm:$0xff]  }
  0xa6   :  { %1695 = vmatprep.subr.bf16.mxu0 %v3523_v54  ;;  %1859 = vmatprep.subr.bf16.mxu1 %v3526_v55  ;;  %v3613_v54 = vld [vmem:[#allocation2 + $0x564] ss:$16 sps:$4 sm:$0xff]   ;;  %v3616_v55 = vld [vmem:[#allocation2 + $0x56c] ss:$16 sps:$4 sm:$0xff]  }
  0xa9   :  { %1696 = vmatpush1.bf16.msra.mxu0 %v3521_v56  ;;  %1860 = vmatpush1.bf16.msra.mxu1 %v3524_v57  ;;  %v3611_v56 = vld [vmem:[#allocation2 + $0x560] ss:$16 sps:$4 sm:$0xff]   ;;  %v3614_v57 = vld [vmem:[#allocation2 + $0x568] ss:$16 sps:$4 sm:$0xff]  }
  0xaa   :  { %1697 = vmatprep.subr.bf16.mxu0 %v3529_v58  ;;  %1861 = vmatprep.subr.bf16.mxu1 %v3532_v59  ;;  %v3619_v58 = vld [vmem:[#allocation2 + $0x584] ss:$16 sps:$4 sm:$0xff]   ;;  %v3622_v59 = vld [vmem:[#allocation2 + $0x58c] ss:$16 sps:$4 sm:$0xff]  }
  0xad   :  { %1698 = vmatpush1.bf16.msra.mxu0 %v3527_v60  ;;  %1862 = vmatpush1.bf16.msra.mxu1 %v3530_v61  ;;  %v3617_v60 = vld [vmem:[#allocation2 + $0x580] ss:$16 sps:$4 sm:$0xff]   ;;  %v3620_v61 = vld [vmem:[#allocation2 + $0x588] ss:$16 sps:$4 sm:$0xff]  }
  0xae   :  { %1699 = vmatprep.subr.bf16.mxu0 %v3535_v62  ;;  %1863 = vmatprep.subr.bf16.mxu1 %v3538_v63  ;;  %v3625_v62 = vld [vmem:[#allocation2 + $0x5a4] ss:$16 sps:$4 sm:$0xff]   ;;  %v3628_v63 = vld [vmem:[#allocation2 + $0x5ac] ss:$16 sps:$4 sm:$0xff]  }
  0xb1   :  { %1700 = vmatpush1.bf16.msra.mxu0 %v3533_v0  ;;  %1864 = vmatpush1.bf16.msra.mxu1 %v3536_v1  ;;  %v3623_v0 = vld [vmem:[#allocation2 + $0x5a0] ss:$16 sps:$4 sm:$0xff]   ;;  %v3626_v1 = vld [vmem:[#allocation2 + $0x5a8] ss:$16 sps:$4 sm:$0xff]  }
  0xb2   :  { %1701 = vmatprep.subr.bf16.mxu0 %v3541_v2  ;;  %1865 = vmatprep.subr.bf16.mxu1 %v3544_v3  ;;  %v3631_v2 = vld [vmem:[#allocation2 + $0x5c4] ss:$16 sps:$4 sm:$0xff]   ;;  %v3634_v3 = vld [vmem:[#allocation2 + $0x5cc] ss:$16 sps:$4 sm:$0xff]  }
  0xb5   :  { %1702 = vmatpush1.bf16.msra.mxu0 %v3539_v4  ;;  %1866 = vmatpush1.bf16.msra.mxu1 %v3542_v5  ;;  %v3629_v4 = vld [vmem:[#allocation2 + $0x5c0] ss:$16 sps:$4 sm:$0xff]   ;;  %v3632_v5 = vld [vmem:[#allocation2 + $0x5c8] ss:$16 sps:$4 sm:$0xff]  }
  0xb6   :  { %1712 = vmatprep.subr.bf16.mxu0 %v3547_v6  ;;  %1876 = vmatprep.subr.bf16.mxu1 %v3550_v8  ;;  %v3637_v6 = vld [vmem:[#allocation2 + $0x5e4] ss:$16 sps:$4 sm:$0xff]   ;;  %v3635_v8 = vld [vmem:[#allocation2 + $0x5e0] ss:$16 sps:$4 sm:$0xff]  }
  0xb8   :  { %1704 = vmatmul.mubr.bf16.vlgmr.msra.gmra.mrb[0].mxu0 %v85_v11  ;;  %1868 = vmatmul.mubr.bf16.vlgmr.msra.gmra.mrb[0].mxu1 %v85_v11  ;;  %v3646_v11 = vld [vmem:[#allocation2 + $0x60c] ss:$16 sps:$4 sm:$0xff]  }
  0xb9   :  { %1713 = vmatpush1.bf16.msra.mxu0 %v3545_v9  ;;  %1877 = vmatpush1.bf16.msra.mxu1 %v3548_v10  ;;  %v3638_v9 = vld [vmem:[#allocation2 + $0x5e8] ss:$16 sps:$4 sm:$0xff]   ;;  %v3643_v10 = vld [vmem:[#allocation2 + $0x604] ss:$16 sps:$4 sm:$0xff]  }
  0xba   :  { %1714 = vmatprep.subr.bf16.mxu0 %v3553_v12  ;;  %1878 = vmatprep.subr.bf16.mxu1 %v3556_v13  ;;  %v79_v12 = vld [vmem:[%s4229_s0 + $0x20] sm:$0xff]  ;;  %v82_v13 = vld [vmem:[%s4229_s0 + $0x38] sm:$0xff] }
  0xbb   :  { %1744 = vmatprep.mubr.bf16.mxu0 %v88_v15  ;;  %1908 = vmatprep.mubr.bf16.mxu1 %v88_v15  ;;  %v3644_v15 = vld [vmem:[#allocation2 + $0x608] ss:$16 sps:$4 sm:$0xff]  }
  0xbd   :  { %1715 = vmatpush1.bf16.msra.mxu0 %v3551_v16  ;;  %1879 = vmatpush1.bf16.msra.mxu1 %v3554_v17  ;;  %v87_v16 = vpack.c.bf16 %v79_v12, %v79_v12  ;;  %v3649_v17 = vld [vmem:[#allocation2 + $0x624] ss:$16 sps:$4 sm:$0xff]  }
  0xbe   :  { %1716 = vmatprep.subr.bf16.mxu0 %v3559_v18  ;;  %1880 = vmatprep.subr.bf16.mxu1 %v3562_v19  ;;  %v3652_v18 = vld [vmem:[#allocation2 + $0x62c] ss:$16 sps:$4 sm:$0xff]   ;;  %v3647_v19 = vld [vmem:[#allocation2 + $0x620] ss:$16 sps:$4 sm:$0xff]  }
  0xbf   :  { %v81_v12 = vld [vmem:[%s4229_s0 + $0x30] sm:$0xff] }
  0xc1   :  { %1717 = vmatpush1.bf16.msra.mxu0 %v3557_v20  ;;  %1881 = vmatpush1.bf16.msra.mxu1 %v3560_v21  ;;  %v3650_v20 = vld [vmem:[#allocation2 + $0x628] ss:$16 sps:$4 sm:$0xff]   ;;  %v90_v21 = vpack.c.bf16 %v82_v13, %v82_v13 }
  0xc2   :  { %1718 = vmatprep.subr.bf16.mxu0 %v3565_v22  ;;  %1882 = vmatprep.subr.bf16.mxu1 %v3568_v23  ;;  %v3655_v22 = vld [vmem:[#allocation2 + $0x644] ss:$16 sps:$4 sm:$0xff]   ;;  %v3658_v23 = vld [vmem:[#allocation2 + $0x64c] ss:$16 sps:$4 sm:$0xff]  }
  0xc5   :  { %1719 = vmatpush1.bf16.msra.mxu0 %v3563_v24  ;;  %1883 = vmatpush1.bf16.msra.mxu1 %v3566_v25  ;;  %v3653_v24 = vld [vmem:[#allocation2 + $0x640] ss:$16 sps:$4 sm:$0xff]   ;;  %v3656_v25 = vld [vmem:[#allocation2 + $0x648] ss:$16 sps:$4 sm:$0xff]  }
  0xc6   :  { %1720 = vmatprep.subr.bf16.mxu0 %v3571_v26  ;;  %1884 = vmatprep.subr.bf16.mxu1 %v3574_v27  ;;  %v3661_v26 = vld [vmem:[#allocation2 + $0x664] ss:$16 sps:$4 sm:$0xff]   ;;  %v3664_v27 = vld [vmem:[#allocation2 + $0x66c] ss:$16 sps:$4 sm:$0xff]  }
  0xc9   :  { %1721 = vmatpush1.bf16.msra.mxu0 %v3569_v28  ;;  %1885 = vmatpush1.bf16.msra.mxu1 %v3572_v29  ;;  %v3659_v28 = vld [vmem:[#allocation2 + $0x660] ss:$16 sps:$4 sm:$0xff]   ;;  %v3662_v29 = vld [vmem:[#allocation2 + $0x668] ss:$16 sps:$4 sm:$0xff]  }
  0xca   :  { %1722 = vmatprep.subr.bf16.mxu0 %v3577_v30  ;;  %1886 = vmatprep.subr.bf16.mxu1 %v3580_v31  ;;  %v3667_v30 = vld [vmem:[#allocation2 + $0x684] ss:$16 sps:$4 sm:$0xff]   ;;  %v3670_v31 = vld [vmem:[#allocation2 + $0x68c] ss:$16 sps:$4 sm:$0xff]  }
  0xcd   :  { %1723 = vmatpush1.bf16.msra.mxu0 %v3575_v32  ;;  %1887 = vmatpush1.bf16.msra.mxu1 %v3578_v33  ;;  %v3665_v32 = vld [vmem:[#allocation2 + $0x680] ss:$16 sps:$4 sm:$0xff]   ;;  %v3668_v33 = vld [vmem:[#allocation2 + $0x688] ss:$16 sps:$4 sm:$0xff]  }
  0xce   :  { %1724 = vmatprep.subr.bf16.mxu0 %v3583_v34  ;;  %1888 = vmatprep.subr.bf16.mxu1 %v3586_v35  ;;  %v3673_v34 = vld [vmem:[#allocation2 + $0x6a4] ss:$16 sps:$4 sm:$0xff]   ;;  %v3676_v35 = vld [vmem:[#allocation2 + $0x6ac] ss:$16 sps:$4 sm:$0xff]  }
  0xd1   :  { %1725 = vmatpush1.bf16.msra.mxu0 %v3581_v36  ;;  %1889 = vmatpush1.bf16.msra.mxu1 %v3584_v37  ;;  %v3671_v36 = vld [vmem:[#allocation2 + $0x6a0] ss:$16 sps:$4 sm:$0xff]   ;;  %v3674_v37 = vld [vmem:[#allocation2 + $0x6a8] ss:$16 sps:$4 sm:$0xff]  }
  0xd2   :  { %1726 = vmatprep.subr.bf16.mxu0 %v3589_v38  ;;  %1890 = vmatprep.subr.bf16.mxu1 %v3592_v39  ;;  %v3679_v38 = vld [vmem:[#allocation2 + $0x6c4] ss:$16 sps:$4 sm:$0xff]   ;;  %v3682_v39 = vld [vmem:[#allocation2 + $0x6cc] ss:$16 sps:$4 sm:$0xff]  }
  0xd5   :  { %1727 = vmatpush1.bf16.msra.mxu0 %v3587_v40  ;;  %1891 = vmatpush1.bf16.msra.mxu1 %v3590_v41  ;;  %v3677_v40 = vld [vmem:[#allocation2 + $0x6c0] ss:$16 sps:$4 sm:$0xff]   ;;  %v3680_v41 = vld [vmem:[#allocation2 + $0x6c8] ss:$16 sps:$4 sm:$0xff]  }
  0xd6   :  { %1728 = vmatprep.subr.bf16.mxu0 %v3595_v42  ;;  %1892 = vmatprep.subr.bf16.mxu1 %v3598_v43  ;;  %v3685_v42 = vld [vmem:[#allocation2 + $0x6e4] ss:$16 sps:$4 sm:$0xff]   ;;  %v3688_v43 = vld [vmem:[#allocation2 + $0x6ec] ss:$16 sps:$4 sm:$0xff]  }
  0xd9   :  { %1729 = vmatpush1.bf16.msra.mxu0 %v3593_v44  ;;  %1893 = vmatpush1.bf16.msra.mxu1 %v3596_v45  ;;  %v3683_v44 = vld [vmem:[#allocation2 + $0x6e0] ss:$16 sps:$4 sm:$0xff]   ;;  %v3686_v45 = vld [vmem:[#allocation2 + $0x6e8] ss:$16 sps:$4 sm:$0xff]  }
  0xda   :  { %1730 = vmatprep.subr.bf16.mxu0 %v3601_v46  ;;  %1894 = vmatprep.subr.bf16.mxu1 %v3604_v47  ;;  %v3691_v46 = vld [vmem:[#allocation2 + $0x704] ss:$16 sps:$4 sm:$0xff]   ;;  %v3694_v47 = vld [vmem:[#allocation2 + $0x70c] ss:$16 sps:$4 sm:$0xff]  }
  0xdd   :  { %1731 = vmatpush1.bf16.msra.mxu0 %v3599_v48  ;;  %1895 = vmatpush1.bf16.msra.mxu1 %v3602_v49  ;;  %v3689_v48 = vld [vmem:[#allocation2 + $0x700] ss:$16 sps:$4 sm:$0xff]   ;;  %v3692_v49 = vld [vmem:[#allocation2 + $0x708] ss:$16 sps:$4 sm:$0xff]  }
  0xde   :  { %1732 = vmatprep.subr.bf16.mxu0 %v3607_v50  ;;  %1896 = vmatprep.subr.bf16.mxu1 %v3610_v51  ;;  %v3697_v50 = vld [vmem:[#allocation2 + $0x724] ss:$16 sps:$4 sm:$0xff]   ;;  %v3700_v51 = vld [vmem:[#allocation2 + $0x72c] ss:$16 sps:$4 sm:$0xff]  }
  0xe1   :  { %1733 = vmatpush1.bf16.msra.mxu0 %v3605_v52  ;;  %1897 = vmatpush1.bf16.msra.mxu1 %v3608_v53  ;;  %v3695_v52 = vld [vmem:[#allocation2 + $0x720] ss:$16 sps:$4 sm:$0xff]   ;;  %v3698_v53 = vld [vmem:[#allocation2 + $0x728] ss:$16 sps:$4 sm:$0xff]  }
  0xe2   :  { %1734 = vmatprep.subr.bf16.mxu0 %v3613_v54  ;;  %1898 = vmatprep.subr.bf16.mxu1 %v3616_v55  ;;  %v3703_v54 = vld [vmem:[#allocation2 + $0x744] ss:$16 sps:$4 sm:$0xff]   ;;  %v3706_v55 = vld [vmem:[#allocation2 + $0x74c] ss:$16 sps:$4 sm:$0xff]  }
  0xe5   :  { %1735 = vmatpush1.bf16.msra.mxu0 %v3611_v56  ;;  %1899 = vmatpush1.bf16.msra.mxu1 %v3614_v57  ;;  %v3701_v56 = vld [vmem:[#allocation2 + $0x740] ss:$16 sps:$4 sm:$0xff]   ;;  %v3704_v57 = vld [vmem:[#allocation2 + $0x748] ss:$16 sps:$4 sm:$0xff]  }
  0xe6   :  { %1736 = vmatprep.subr.bf16.mxu0 %v3619_v58  ;;  %1900 = vmatprep.subr.bf16.mxu1 %v3622_v59  ;;  %v3709_v58 = vld [vmem:[#allocation2 + $0x764] ss:$16 sps:$4 sm:$0xff]   ;;  %v3712_v59 = vld [vmem:[#allocation2 + $0x76c] ss:$16 sps:$4 sm:$0xff]  }
  0xe9   :  { %1737 = vmatpush1.bf16.msra.mxu0 %v3617_v60  ;;  %1901 = vmatpush1.bf16.msra.mxu1 %v3620_v61  ;;  %v3707_v60 = vld [vmem:[#allocation2 + $0x760] ss:$16 sps:$4 sm:$0xff]   ;;  %v3710_v61 = vld [vmem:[#allocation2 + $0x768] ss:$16 sps:$4 sm:$0xff]  }
  0xea   :  { %1738 = vmatprep.subr.bf16.mxu0 %v3625_v62  ;;  %1902 = vmatprep.subr.bf16.mxu1 %v3628_v63  ;;  %v3715_v62 = vld [vmem:[#allocation2 + $0x784] ss:$16 sps:$4 sm:$0xff]   ;;  %v3718_v63 = vld [vmem:[#allocation2 + $0x78c] ss:$16 sps:$4 sm:$0xff]  }
  0xed   :  { %1739 = vmatpush1.bf16.msra.mxu0 %v3623_v0  ;;  %1903 = vmatpush1.bf16.msra.mxu1 %v3626_v1  ;;  %v3713_v0 = vld [vmem:[#allocation2 + $0x780] ss:$16 sps:$4 sm:$0xff]   ;;  %v3716_v1 = vld [vmem:[#allocation2 + $0x788] ss:$16 sps:$4 sm:$0xff]  }
  0xee   :  { %1740 = vmatprep.subr.bf16.mxu0 %v3631_v2  ;;  %1904 = vmatprep.subr.bf16.mxu1 %v3634_v3  ;;  %v3721_v2 = vld [vmem:[#allocation2 + $0x7a4] ss:$16 sps:$4 sm:$0xff]   ;;  %v3724_v3 = vld [vmem:[#allocation2 + $0x7ac] ss:$16 sps:$4 sm:$0xff]  }
  0xf1   :  { %1741 = vmatpush1.bf16.msra.mxu0 %v3629_v4  ;;  %1905 = vmatpush1.bf16.msra.mxu1 %v3632_v5  ;;  %v339_v4 = vld [vmem:[#allocation2 + $0x7c0] sm:$0xff]  ;;  %v340_v5 = vld [vmem:[#allocation2 + $0x7c8] sm:$0xff] }
  0xf2   :  { %1742 = vmatprep.subr.bf16.mxu0 %v3637_v6  ;;  %1906 = vmatprep.subr.bf16.mxu1 %v3640_v7  ;;  %v3719_v6 = vld [vmem:[#allocation2 + $0x7a0] ss:$16 sps:$4 sm:$0xff]   ;;  %v3722_v7 = vld [vmem:[#allocation2 + $0x7a8] ss:$16 sps:$4 sm:$0xff]  }
  0xf5   :  { %1743 = vmatpush1.bf16.msra.mxu0 %v3635_v8  ;;  %1907 = vmatpush1.bf16.msra.mxu1 %v3638_v9  ;;  %v3169_v8 = vcombine.high %v339_v4, %v339_v4  ;;  %v3171_v9 = vcombine.high %v340_v5, %v340_v5 }
  0xf6   :  { %1753 = vmatprep.subr.bf16.mxu0 %v3643_v10  ;;  %1917 = vmatprep.subr.bf16.mxu1 %v3646_v11  ;;  %v3168_v10 = vcombine.low %v339_v4, %v339_v4  ;;  %v3170_v11 = vcombine.low %v340_v5, %v340_v5  ;;  %v3852_v4 = vld [vmem:[#allocation7 + $0x90] ss:$8 sps:$4 sm:$0xff]   ;;  %v3857_v5 = vld [vmem:[#allocation7 + $0xa4] ss:$8 sps:$4 sm:$0xff]  }
  0xf8   :  { %1745 = vmatmul.mubr.bf16.vlgmr.msra.gmra.mrb[0].mxu0 %v87_v16  ;;  %1909 = vmatmul.mubr.bf16.vlgmr.msra.gmra.mrb[0].mxu1 %v87_v16  ;;  %v1619_v13 = vsel %vm1617_vm1, %v3168_v10, 0  ;;  %v89_v16 = vpack.c.bf16 %v81_v12, %v81_v12  ;;  %v3861_v12 = vld [vmem:[#allocation7 + $0xc0] ss:$8 sps:$4 sm:$0xff]  }
  0xf9   :  { %1754 = vmatpush1.bf16.msra.mxu0 %v3641_v14  ;;  %1918 = vmatpush1.bf16.msra.mxu1 %v3644_v15  ;;  %v1625_v14 = vsel %vm1617_vm1, %v3170_v11, 0  ;;  %v3731_v15 = vld [vmem:[#allocation5 + $0x4] ss:$8 sps:$4 sm:$0xff]  }
  0xfa   :  { %1755 = vmatprep.subr.bf16.mxu0 %v3649_v17  ;;  %1919 = vmatprep.subr.bf16.mxu1 %v3652_v18  ;;  %v3729_v17 = vld [vmem:[#allocation5] ss:$8 sps:$4 sm:$0xff]   ;;  %v3734_v18 = vld [vmem:[#allocation5 + $0x14] ss:$8 sps:$4 sm:$0xff]   ;;  %v3863_v11 = vld [vmem:[#allocation7 + $0xc4] ss:$8 sps:$4 sm:$0xff]  }
  0xfb   :  { %3173 = vmatprep.mubr.msk.bf16.mxu0 %vm1613_vm0, %v90_v21  ;;  %3175 = vmatprep.mubr.msk.bf16.mxu1 %vm1613_vm0, %v90_v21  ;;  %v3735_v21 = vld [vmem:[#allocation5 + $0x20] ss:$8 sps:$4 sm:$0xff]  }
  0xfd   :  { %1756 = vmatpush1.bf16.msra.mxu0 %v3647_v19  ;;  %1920 = vmatpush1.bf16.msra.mxu1 %v3650_v20  ;;  %v3732_v19 = vld [vmem:[#allocation5 + $0x10] ss:$8 sps:$4 sm:$0xff]   ;;  %v3737_v20 = vld [vmem:[#allocation5 + $0x24] ss:$8 sps:$4 sm:$0xff]  }
  0xfe   :  { %1757 = vmatprep.subr.bf16.mxu0 %v3655_v22  ;;  %1921 = vmatprep.subr.bf16.mxu1 %v3658_v23  ;;  %v3740_v22 = vld [vmem:[#allocation5 + $0x34] ss:$8 sps:$4 sm:$0xff]   ;;  %v3738_v23 = vld [vmem:[#allocation5 + $0x30] ss:$8 sps:$4 sm:$0xff]  }
 0x101   :  { %1758 = vmatpush1.bf16.msra.mxu0 %v3653_v24  ;;  %1922 = vmatpush1.bf16.msra.mxu1 %v3656_v25  ;;  %v3743_v24 = vld [vmem:[#allocation5 + $0x44] ss:$8 sps:$4 sm:$0xff]   ;;  %v3741_v25 = vld [vmem:[#allocation5 + $0x40] ss:$8 sps:$4 sm:$0xff]  }
 0x102   :  { %1759 = vmatprep.subr.bf16.mxu0 %v3661_v26  ;;  %1923 = vmatprep.subr.bf16.mxu1 %v3664_v27  ;;  %v3746_v26 = vld [vmem:[#allocation5 + $0x54] ss:$8 sps:$4 sm:$0xff]   ;;  %v3744_v27 = vld [vmem:[#allocation5 + $0x50] ss:$8 sps:$4 sm:$0xff]  }
 0x105   :  { %1760 = vmatpush1.bf16.msra.mxu0 %v3659_v28  ;;  %1924 = vmatpush1.bf16.msra.mxu1 %v3662_v29  ;;  %v3749_v28 = vld [vmem:[#allocation5 + $0x64] ss:$8 sps:$4 sm:$0xff]   ;;  %v3747_v29 = vld [vmem:[#allocation5 + $0x60] ss:$8 sps:$4 sm:$0xff]  }
 0x106   :  { %1761 = vmatprep.subr.bf16.mxu0 %v3667_v30  ;;  %1925 = vmatprep.subr.bf16.mxu1 %v3670_v31  ;;  %v3752_v30 = vld [vmem:[#allocation5 + $0x74] ss:$8 sps:$4 sm:$0xff]   ;;  %v3750_v31 = vld [vmem:[#allocation5 + $0x70] ss:$8 sps:$4 sm:$0xff]  }
 0x109   :  { %1762 = vmatpush1.bf16.msra.mxu0 %v3665_v32  ;;  %1926 = vmatpush1.bf16.msra.mxu1 %v3668_v33  ;;  %v3755_v32 = vld [vmem:[#allocation5 + $0x84] ss:$8 sps:$4 sm:$0xff]   ;;  %v3753_v33 = vld [vmem:[#allocation5 + $0x80] ss:$8 sps:$4 sm:$0xff]  }
 0x10a   :  { %1763 = vmatprep.subr.bf16.mxu0 %v3673_v34  ;;  %1927 = vmatprep.subr.bf16.mxu1 %v3676_v35  ;;  %v3758_v34 = vld [vmem:[#allocation5 + $0x94] ss:$8 sps:$4 sm:$0xff]   ;;  %v3756_v35 = vld [vmem:[#allocation5 + $0x90] ss:$8 sps:$4 sm:$0xff]  }
 0x10d   :  { %1764 = vmatpush1.bf16.msra.mxu0 %v3671_v36  ;;  %1928 = vmatpush1.bf16.msra.mxu1 %v3674_v37  ;;  %v3761_v36 = vld [vmem:[#allocation5 + $0xa4] ss:$8 sps:$4 sm:$0xff]   ;;  %v3759_v37 = vld [vmem:[#allocation5 + $0xa0] ss:$8 sps:$4 sm:$0xff]  }
 0x10e   :  { %1765 = vmatprep.subr.bf16.mxu0 %v3679_v38  ;;  %1929 = vmatprep.subr.bf16.mxu1 %v3682_v39  ;;  %v3764_v38 = vld [vmem:[#allocation5 + $0xb4] ss:$8 sps:$4 sm:$0xff]   ;;  %v3762_v39 = vld [vmem:[#allocation5 + $0xb0] ss:$8 sps:$4 sm:$0xff]  }
 0x111   :  { %1766 = vmatpush1.bf16.msra.mxu0 %v3677_v40  ;;  %1930 = vmatpush1.bf16.msra.mxu1 %v3680_v41  ;;  %v3767_v40 = vld [vmem:[#allocation5 + $0xc4] ss:$8 sps:$4 sm:$0xff]   ;;  %v3765_v41 = vld [vmem:[#allocation5 + $0xc0] ss:$8 sps:$4 sm:$0xff]  }
 0x112   :  { %1767 = vmatprep.subr.bf16.mxu0 %v3685_v42  ;;  %1931 = vmatprep.subr.bf16.mxu1 %v3688_v43  ;;  %v3770_v42 = vld [vmem:[#allocation5 + $0xd4] ss:$8 sps:$4 sm:$0xff]   ;;  %v3768_v43 = vld [vmem:[#allocation5 + $0xd0] ss:$8 sps:$4 sm:$0xff]  }
 0x115   :  { %1768 = vmatpush1.bf16.msra.mxu0 %v3683_v44  ;;  %1932 = vmatpush1.bf16.msra.mxu1 %v3686_v45  ;;  %v3773_v44 = vld [vmem:[#allocation5 + $0xe4] ss:$8 sps:$4 sm:$0xff]   ;;  %v3771_v45 = vld [vmem:[#allocation5 + $0xe0] ss:$8 sps:$4 sm:$0xff]  }
 0x116   :  { %1769 = vmatprep.subr.bf16.mxu0 %v3691_v46  ;;  %1933 = vmatprep.subr.bf16.mxu1 %v3694_v47  ;;  %v3776_v46 = vld [vmem:[#allocation5 + $0xf4] ss:$8 sps:$4 sm:$0xff]   ;;  %v3774_v47 = vld [vmem:[#allocation5 + $0xf0] ss:$8 sps:$4 sm:$0xff]  }
 0x119   :  { %1770 = vmatpush1.bf16.msra.mxu0 %v3689_v48  ;;  %1934 = vmatpush1.bf16.msra.mxu1 %v3692_v49  ;;  %v3779_v48 = vld [vmem:[#allocation5 + $0x104] ss:$8 sps:$4 sm:$0xff]   ;;  %v3825_v49 = vld [vmem:[#allocation7] ss:$8 sps:$4 sm:$0xff]  }
 0x11a   :  { %1771 = vmatprep.subr.bf16.mxu0 %v3697_v50  ;;  %1935 = vmatprep.subr.bf16.mxu1 %v3700_v51  ;;  %v3827_v50 = vld [vmem:[#allocation7 + $0x4] ss:$8 sps:$4 sm:$0xff]   ;;  %v3830_v51 = vld [vmem:[#allocation7 + $0x14] ss:$8 sps:$4 sm:$0xff]  }
 0x11d   :  { %1772 = vmatpush1.bf16.msra.mxu0 %v3695_v52  ;;  %1936 = vmatpush1.bf16.msra.mxu1 %v3698_v53  ;;  %v3828_v52 = vld [vmem:[#allocation7 + $0x10] ss:$8 sps:$4 sm:$0xff]   ;;  %v3833_v53 = vld [vmem:[#allocation7 + $0x24] ss:$8 sps:$4 sm:$0xff]  }
 0x11e   :  { %1773 = vmatprep.subr.bf16.mxu0 %v3703_v54  ;;  %1937 = vmatprep.subr.bf16.mxu1 %v3706_v55  ;;  %v3831_v54 = vld [vmem:[#allocation7 + $0x20] ss:$8 sps:$4 sm:$0xff]   ;;  %v3836_v55 = vld [vmem:[#allocation7 + $0x34] ss:$8 sps:$4 sm:$0xff]  }
 0x121   :  { %1774 = vmatpush1.bf16.msra.mxu0 %v3701_v56  ;;  %1938 = vmatpush1.bf16.msra.mxu1 %v3704_v57  ;;  %v3834_v56 = vld [vmem:[#allocation7 + $0x30] ss:$8 sps:$4 sm:$0xff]   ;;  %v3839_v57 = vld [vmem:[#allocation7 + $0x44] ss:$8 sps:$4 sm:$0xff]  }
 0x122   :  { %1775 = vmatprep.subr.bf16.mxu0 %v3709_v58  ;;  %1939 = vmatprep.subr.bf16.mxu1 %v3712_v59  ;;  %v3837_v58 = vld [vmem:[#allocation7 + $0x40] ss:$8 sps:$4 sm:$0xff]   ;;  %v3842_v59 = vld [vmem:[#allocation7 + $0x54] ss:$8 sps:$4 sm:$0xff]  }
 0x125   :  { %1776 = vmatpush1.bf16.msra.mxu0 %v3707_v60  ;;  %1940 = vmatpush1.bf16.msra.mxu1 %v3710_v61  ;;  %v3840_v60 = vld [vmem:[#allocation7 + $0x50] ss:$8 sps:$4 sm:$0xff]   ;;  %v3845_v61 = vld [vmem:[#allocation7 + $0x64] ss:$8 sps:$4 sm:$0xff]  }
 0x126   :  { %1777 = vmatprep.subr.bf16.mxu0 %v3715_v62  ;;  %1941 = vmatprep.subr.bf16.mxu1 %v3718_v63  ;;  %v3843_v62 = vld [vmem:[#allocation7 + $0x60] ss:$8 sps:$4 sm:$0xff]   ;;  %v3848_v63 = vld [vmem:[#allocation7 + $0x74] ss:$8 sps:$4 sm:$0xff]  }
 0x129   :  { %1778 = vmatpush1.bf16.msra.mxu0 %v3713_v0  ;;  %1942 = vmatpush1.bf16.msra.mxu1 %v3716_v1  ;;  %v3846_v0 = vld [vmem:[#allocation7 + $0x70] ss:$8 sps:$4 sm:$0xff]   ;;  %v3851_v1 = vld [vmem:[#allocation7 + $0x84] ss:$8 sps:$4 sm:$0xff]  }
 0x12a   :  { %1779 = vmatprep.subr.bf16.mxu0 %v3721_v2  ;;  %1943 = vmatprep.subr.bf16.mxu1 %v3724_v3  ;;  %v3849_v2 = vld [vmem:[#allocation7 + $0x80] ss:$8 sps:$4 sm:$0xff]   ;;  %v3854_v3 = vld [vmem:[#allocation7 + $0x94] ss:$8 sps:$4 sm:$0xff]  }
 0x12d   :  { %1780 = vmatpush1.bf16.msra.mxu0 %v3719_v6  ;;  %1944 = vmatpush1.bf16.msra.mxu1 %v3722_v7  ;;  %v3855_v6 = vld [vmem:[#allocation7 + $0xa0] ss:$8 sps:$4 sm:$0xff]   ;;  %v343_v7 = vlaneseq }
 0x12e   :  { %3172 = vmatprep.subr.msk.bf16.mxu0 %vm1617_vm1, %v3169_v8  ;;  %3174 = vmatprep.subr.msk.bf16.mxu1 %vm1617_vm1, %v3171_v9  ;;  %v3860_v8 = vld [vmem:[#allocation7 + $0xb4] ss:$8 sps:$4 sm:$0xff]   ;;  %v3858_v9 = vld [vmem:[#allocation7 + $0xb0] ss:$8 sps:$4 sm:$0xff]  }
 0x12f   :  { %v4112_v10 = vshrl.u32 %v343_v7, 7 }
 0x131   :  { %1782 = vmatpush1.bf16.msra.mxu0 %v1619_v13  ;;  %1946 = vmatpush1.bf16.msra.mxu1 %v1625_v14  ;;  %v4115_v13 = vsub.s32 0, %v4112_v10  ;;  %v3866_v14 = vld [vmem:[#allocation7 + $0xd4] ss:$8 sps:$4 sm:$0xff]  }
 0x132   :  { %2362 = vmatprep.subr.bf16.mxu0 %v3731_v15  ;;  %2652 = vmatprep.subr.bf16.mxu1 %v3827_v50  ;;  %v4120_v15 = vld [vmem:[%s4231_s2] sm:$0xf]  ;;  %v3797_v50 = vld [vmem:[#allocation5 + $0x164] ss:$8 sps:$4 sm:$0xff]  }
 0x134   :  { %1786 = vmatmul.mubr.bf16.vlgmr.msra.gmra.mrb[0].mxu0 %v89_v16  ;;  %1950 = vmatmul.mubr.bf16.vlgmr.msra.gmra.mrb[0].mxu1 %v89_v16  ;;  %v4123_v16 = vsub.s32 1, %v4112_v10 }
 0x135   :  { %2363 = vmatpush1.bf16.msra.mxu0 %v3729_v17  ;;  %2653 = vmatpush1.bf16.msra.mxu1 %v3825_v49  ;;  %v357_v17 = vsub.s32 3, %v4112_v10  ;;  %v3792_v49 = vld [vmem:[#allocation5 + $0x150] ss:$8 sps:$4 sm:$0xff]  }
 0x136   :  { %2364 = vmatprep.subr.bf16.mxu0 %v3734_v18  ;;  %2654 = vmatprep.subr.bf16.mxu1 %v3830_v51  ;;  %v3864_v18 = vld [vmem:[#allocation7 + $0xd0] ss:$8 sps:$4 sm:$0xff]   ;;  %v3795_v51 = vld [vmem:[#allocation5 + $0x160] ss:$8 sps:$4 sm:$0xff]  }
 0x139   :  { %2365 = vmatpush1.bf16.msra.mxu0 %v3732_v19  ;;  %2655 = vmatpush1.bf16.msra.mxu1 %v3828_v52  ;;  %v346_v19 = vrot.slane %v4120_v15, %v4115_v13  ;;  %v3800_v52 = vld [vmem:[#allocation5 + $0x174] ss:$8 sps:$4 sm:$0xff]  }
 0x13a   :  { %2366 = vmatprep.subr.bf16.mxu0 %v3737_v20  ;;  %2656 = vmatprep.subr.bf16.mxu1 %v3833_v53  ;;  %v350_v20 = vrot.slane %v4120_v15, %v4123_v16  ;;  %v3798_v53 = vld [vmem:[#allocation5 + $0x170] ss:$8 sps:$4 sm:$0xff]  }
 0x13d   :  { %2367 = vmatpush1.bf16.msra.mxu0 %v3735_v21  ;;  %2657 = vmatpush1.bf16.msra.mxu1 %v3831_v54  ;;  %v358_v21 = vrot.slane %v4120_v15, %v357_v17  ;;  %v3803_v54 = vld [vmem:[#allocation5 + $0x184] ss:$8 sps:$4 sm:$0xff]   ;;  %v3870_v17 = vld [vmem:[#allocation7 + $0xf0] ss:$8 sps:$4 sm:$0xff]  }
 0x13e   :  { %2368 = vmatprep.subr.bf16.mxu0 %v3740_v22  ;;  %2658 = vmatprep.subr.bf16.mxu1 %v3836_v55  ;;  %v3801_v55 = vld [vmem:[#allocation5 + $0x180] ss:$8 sps:$4 sm:$0xff]  }
 0x141   :  { %2369 = vmatpush1.bf16.msra.mxu0 %v3738_v23  ;;  %2659 = vmatpush1.bf16.msra.mxu1 %v3834_v56  ;;  %v3806_v56 = vld [vmem:[#allocation5 + $0x194] ss:$8 sps:$4 sm:$0xff]  }
 0x142   :  { %2370 = vmatprep.subr.bf16.mxu0 %v3743_v24  ;;  %2660 = vmatprep.subr.bf16.mxu1 %v3839_v57  ;;  %v3804_v57 = vld [vmem:[#allocation5 + $0x190] ss:$8 sps:$4 sm:$0xff]  }
 0x145   :  { %2371 = vmatpush1.bf16.msra.mxu0 %v3741_v25  ;;  %2661 = vmatpush1.bf16.msra.mxu1 %v3837_v58  ;;  %v3809_v58 = vld [vmem:[#allocation5 + $0x1a4] ss:$8 sps:$4 sm:$0xff]  }
 0x146   :  { %2372 = vmatprep.subr.bf16.mxu0 %v3746_v26  ;;  %2662 = vmatprep.subr.bf16.mxu1 %v3842_v59  ;;  %v3807_v59 = vld [vmem:[#allocation5 + $0x1a0] ss:$8 sps:$4 sm:$0xff]  }
 0x149   :  { %2373 = vmatpush1.bf16.msra.mxu0 %v3744_v27  ;;  %2663 = vmatpush1.bf16.msra.mxu1 %v3840_v60  ;;  %v3812_v60 = vld [vmem:[#allocation5 + $0x1b4] ss:$8 sps:$4 sm:$0xff]  }
 0x14a   :  { %2374 = vmatprep.subr.bf16.mxu0 %v3749_v28  ;;  %2664 = vmatprep.subr.bf16.mxu1 %v3845_v61  ;;  %v3810_v61 = vld [vmem:[#allocation5 + $0x1b0] ss:$8 sps:$4 sm:$0xff]  }
 0x14d   :  { %2375 = vmatpush1.bf16.msra.mxu0 %v3747_v29  ;;  %2665 = vmatpush1.bf16.msra.mxu1 %v3843_v62  ;;  %v3815_v62 = vld [vmem:[#allocation5 + $0x1c4] ss:$8 sps:$4 sm:$0xff]  }
 0x14e   :  { %2376 = vmatprep.subr.bf16.mxu0 %v3752_v30  ;;  %2666 = vmatprep.subr.bf16.mxu1 %v3848_v63  ;;  %v3813_v63 = vld [vmem:[#allocation5 + $0x1c0] ss:$8 sps:$4 sm:$0xff]  }
 0x151   :  { %2377 = vmatpush1.bf16.msra.mxu0 %v3750_v31  ;;  %2667 = vmatpush1.bf16.msra.mxu1 %v3846_v0  ;;  %v353_v0 = vsub.s32 2, %v4112_v10 }
 0x152   :  { %2378 = vmatprep.subr.bf16.mxu0 %v3755_v32  ;;  %2668 = vmatprep.subr.bf16.mxu1 %v3851_v1  ;;  %v3818_v1 = vld [vmem:[#allocation5 + $0x1d4] ss:$8 sps:$4 sm:$0xff]  }
 0x155   :  { %2379 = vmatpush1.bf16.msra.mxu0 %v3753_v33  ;;  %2669 = vmatpush1.bf16.msra.mxu1 %v3849_v2  ;;  %v3816_v2 = vld [vmem:[#allocation5 + $0x1d0] ss:$8 sps:$4 sm:$0xff]  }
 0x156   :  { %2380 = vmatprep.subr.bf16.mxu0 %v3758_v34  ;;  %2670 = vmatprep.subr.bf16.mxu1 %v3854_v3  ;;  %v354_v3 = vrot.slane %v4120_v15, %v353_v0  ;;  %v3872_v15 = vld [vmem:[#allocation7 + $0xf4] ss:$8 sps:$4 sm:$0xff]  }
 0x159   :  { %2381 = vmatpush1.bf16.msra.mxu0 %v3756_v35  ;;  %2671 = vmatpush1.bf16.msra.mxu1 %v3852_v4  ;;  %v3821_v4 = vld [vmem:[#allocation5 + $0x1e4] ss:$8 sps:$4 sm:$0xff]  }
 0x15a   :  { %2382 = vmatprep.subr.bf16.mxu0 %v3761_v36  ;;  %2672 = vmatprep.subr.bf16.mxu1 %v3857_v5  ;;  %v3819_v5 = vld [vmem:[#allocation5 + $0x1e0] ss:$8 sps:$4 sm:$0xff]  }
 0x15d   :  { %2383 = vmatpush1.bf16.msra.mxu0 %v3759_v37  ;;  %2673 = vmatpush1.bf16.msra.mxu1 %v3855_v6  ;;  %v3777_v37 = vld [vmem:[#allocation5 + $0x100] ss:$8 sps:$4 sm:$0xff]  }
 0x15e   :  { %2384 = vmatprep.subr.bf16.mxu0 %v3764_v38  ;;  %2674 = vmatprep.subr.bf16.mxu1 %v3860_v8  ;;  %v3824_v8 = vld [vmem:[#allocation5 + $0x1f4] ss:$8 sps:$4 sm:$0xff]  }
 0x161   :  { %2385 = vmatpush1.bf16.msra.mxu0 %v3762_v39  ;;  %2675 = vmatpush1.bf16.msra.mxu1 %v3858_v9  ;;  %v3782_v39 = vld [vmem:[#allocation5 + $0x114] ss:$8 sps:$4 sm:$0xff]   ;;  %v3822_v9 = vld [vmem:[#allocation5 + $0x1f0] ss:$8 sps:$4 sm:$0xff]  }
 0x162   :  { %2386 = vmatprep.subr.bf16.mxu0 %v3767_v40  ;;  %2676 = vmatprep.subr.bf16.mxu1 %v3863_v11 }
 0x165   :  { %2387 = vmatpush1.bf16.msra.mxu0 %v3765_v41  ;;  %2677 = vmatpush1.bf16.msra.mxu1 %v3861_v12  ;;  %v3780_v41 = vld [vmem:[#allocation5 + $0x110] ss:$8 sps:$4 sm:$0xff]   ;;  %v3869_v12 = vld [vmem:[#allocation7 + $0xe4] ss:$8 sps:$4 sm:$0xff]  }
 0x166   :  { %2388 = vmatprep.subr.bf16.mxu0 %v3770_v42  ;;  %2678 = vmatprep.subr.bf16.mxu1 %v3866_v14  ;;  %v3785_v42 = vld [vmem:[#allocation5 + $0x124] ss:$8 sps:$4 sm:$0xff]   ;;  %v3867_v14 = vld [vmem:[#allocation7 + $0xe0] ss:$8 sps:$4 sm:$0xff]  }
 0x169   :  { %2389 = vmatpush1.bf16.msra.mxu0 %v3768_v43  ;;  %2679 = vmatpush1.bf16.msra.mxu1 %v3864_v18  ;;  %v3783_v43 = vld [vmem:[#allocation5 + $0x120] ss:$8 sps:$4 sm:$0xff]   ;;  %v3873_v18 = vld [vmem:[%s4236_s7 + $0x40] sm:$0xff]  }
 0x16a   :  { %2390 = vmatprep.subr.bf16.mxu0 %v3773_v44  ;;  %v3788_v44 = vld [vmem:[#allocation5 + $0x134] ss:$8 sps:$4 sm:$0xff]   ;;  %2680 = vmatprep.subr.bf16.mxu1 %v3869_v12 }
 0x16d   :  { %2391 = vmatpush1.bf16.msra.mxu0 %v3771_v45  ;;  %v3786_v45 = vld [vmem:[#allocation5 + $0x130] ss:$8 sps:$4 sm:$0xff]   ;;  %2681 = vmatpush1.bf16.msra.mxu1 %v3867_v14 }
 0x16e   :  { %2392 = vmatprep.subr.bf16.mxu0 %v3776_v46  ;;  %v3791_v46 = vld [vmem:[#allocation5 + $0x144] ss:$8 sps:$4 sm:$0xff]   ;;  %2682 = vmatprep.subr.bf16.mxu1 %v3872_v15 }
 0x171   :  { %2393 = vmatpush1.bf16.msra.mxu0 %v3774_v47  ;;  %v3789_v47 = vld [vmem:[#allocation5 + $0x140] ss:$8 sps:$4 sm:$0xff]   ;;  %2683 = vmatpush1.bf16.msra.mxu1 %v3870_v17 }
 0x172   :  { %2403 = vmatprep.subr.bf16.mxu0 %v3779_v48  ;;  %v3794_v48 = vld [vmem:[#allocation5 + $0x154] ss:$8 sps:$4 sm:$0xff]   ;;  %3289 = vmatprep.subr.bf16.mxu1 %v3873_v18 }
 0x207   :  { %v1787_v22 = vpop.f32.mrb[0].mxu0  ;;  %v4131_v23 = vpop.f32.mrb[0].mxu1 }
 0x208   :  { %v3311_v24 = vadd.f32 %v1787_v22, %v346_v19  ;;  %v1789_v25 = vpop.f32.mrb[1].mxu0  ;;  %v1953_v26 = vpop.f32.mrb[1].mxu1  ;;  %v3313_v6 = vadd.f32 %v4131_v23, %v354_v3  ;;  %v2030_v19 = vld [vmem:[%s4233_s4] sm:$0x3] }
 0x209   :  { %v3312_v27 = vadd.f32 %v1789_v25, %v350_v20  ;;  %v3314_v28 = vadd.f32 %v1953_v26, %v358_v21  ;;  %v1791_v29 = vpop.f32.mrb[2].mxu0  ;;  %v1955_v30 = vpop.f32.mrb[2].mxu1  ;;  %v2035_v20 = vrot.slane %v2030_v19, %v4115_v13  ;;  %v2039_v21 = vrot.slane %v2030_v19, %v4123_v16 }
 0x20a   :  { %v1958_v31 = vmax.f32 %v3311_v24, 0.0  ;;  %v1792_v32 = vpop.f32.mrb[3].mxu0  ;;  %v1956_v33 = vpop.f32.mrb[3].mxu1  ;;  %v1960_v11 = vmax.f32 %v3313_v6, 0.0 }
 0x20b   :  { %v1959_v34 = vmax.f32 %v3312_v27, 0.0  ;;  %v1961_v35 = vmax.f32 %v3314_v28, 0.0  ;;  %v3875_v33 = vld [vmem:[%s4236_s7 + $0x48] sm:$0xff]  }
 0x20c   :  { %v1962_v38 = vpack.c.bf16 %v1958_v31, %v1958_v31  ;;  %v1964_v10 = vpack.c.bf16 %v1960_v11, %v1960_v11  ;;  %v3874_v31 = vld [vmem:[%s4236_s7] sm:$0xff]  }
 0x20d   :  { %v1963_v36 = vpack.c.bf16 %v1959_v34, %v1959_v34  ;;  %v1965_v40 = vpack.c.bf16 %v1961_v35, %v1961_v35  ;;  %v3876_v34 = vld [vmem:[%s4236_s7 + $0x8] sm:$0xff]   ;;  %v3877_v35 = vld [vmem:[%s4236_s7 + $0x50] sm:$0xff]  }
 0x20f   :  { %2394 = vmatprep.mubr.bf16.mxu0 %v1963_v36  ;;  %v3878_v36 = vld [vmem:[%s4236_s7 + $0x10] sm:$0xff]  }
 0x210   :  { %2395 = vmatmul.mubr.bf16.vlgmr.msra.gmra.mrb[4].mxu0 %v1962_v38  ;;  %v3880_v38 = vld [vmem:[%s4236_s7 + $0x18] sm:$0xff]  }
 0x211   :  { %2404 = vmatpush1.bf16.msra.mxu0 %v3777_v37  ;;  %2435 = vmatprep.mubr.bf16.mxu0 %v1965_v40  ;;  %v3879_v37 = vld [vmem:[%s4236_s7 + $0x58] sm:$0xff]   ;;  %v3882_v40 = vld [vmem:[%s4236_s7 + $0x20] sm:$0xff]  }
 0x212   :  { %2405 = vmatprep.subr.bf16.mxu0 %v3782_v39  ;;  %v3881_v39 = vld [vmem:[%s4236_s7 + $0x60] sm:$0xff]  }
 0x215   :  { %2406 = vmatpush1.bf16.msra.mxu0 %v3780_v41  ;;  %v3883_v41 = vld [vmem:[%s4236_s7 + $0x68] sm:$0xff]  }
 0x216   :  { %2407 = vmatprep.subr.bf16.mxu0 %v3785_v42  ;;  %v3884_v42 = vld [vmem:[%s4236_s7 + $0x28] sm:$0xff]  }
 0x219   :  { %2408 = vmatpush1.bf16.msra.mxu0 %v3783_v43  ;;  %v3885_v43 = vld [vmem:[%s4236_s7 + $0x70] sm:$0xff]  }
 0x21a   :  { %2409 = vmatprep.subr.bf16.mxu0 %v3788_v44  ;;  %v3886_v44 = vld [vmem:[%s4236_s7 + $0x30] sm:$0xff]  }
 0x21d   :  { %2410 = vmatpush1.bf16.msra.mxu0 %v3786_v45  ;;  %v3887_v45 = vld [vmem:[%s4236_s7 + $0x78] sm:$0xff]  }
 0x21e   :  { %2411 = vmatprep.subr.bf16.mxu0 %v3791_v46  ;;  %v3888_v46 = vld [vmem:[%s4236_s7 + $0x38] sm:$0xff]  }
 0x221   :  { %2412 = vmatpush1.bf16.msra.mxu0 %v3789_v47  ;;  %v2480_v47 = vld [vmem:[%s4235_s6] sm:$0x3] }
 0x222   :  { %2413 = vmatprep.subr.bf16.mxu0 %v3794_v48  ;;  %v2485_v48 = vrot.slane %v2480_v47, %v4115_v13  ;;  %v3272_v13 = vld [vmem:[%s4237_s8] ss:$0 sm:$0xff]  ;;  %s3994_s8 = smov [#allocation8]  }
 0x223   :  { %s2910_s5 = sshll.u32 %s3994_s8, 4  ;;  %s2911_s5 = int_to_ptr.vmem [resolvable:$true] %s2910_s5 }
 0x224   :  { %s3959_s19 = scalar_lea.vmem %s2911_s5, 128  ;;  %p3964_p11 = scmp.lt.s32.totalorder %s2911_s5, %s2911_s5 }
 0x225   :  { %2414 = vmatpush1.bf16.msra.mxu0 %v3792_v49  ;;  %v2489_v49 = vrot.slane %v2480_v47, %v4123_v16  ;;  %p3960_p10 = scmp.ne.s32.totalorder %s2911_s5, %s3959_s19  ;;  %p3965_p12 = scmp.lt.s32.totalorder %s3959_s19, %s3959_s19 }
 0x226   :  { %2415 = vmatprep.subr.bf16.mxu0 %v3797_v50 }
 0x227   :  { %p3966_p13 = por %p3965_p12, %p3964_p11 }
 0x229   :  { %2416 = vmatpush1.bf16.msra.mxu0 %v3795_v51  ;;  %p3967_p0 = pnand %p3966_p13, %p3960_p10 }
 0x22a   :  { %2417 = vmatprep.subr.bf16.mxu0 %v3800_v52 }
 0x22d   :  { %2418 = vmatpush1.bf16.msra.mxu0 %v3798_v53 }
 0x22e   :  { %2419 = vmatprep.subr.bf16.mxu0 %v3803_v54 }
 0x231   :  { %2420 = vmatpush1.bf16.msra.mxu0 %v3801_v55 }
 0x232   :  { %2421 = vmatprep.subr.bf16.mxu0 %v3806_v56 }
 0x235   :  { %2422 = vmatpush1.bf16.msra.mxu0 %v3804_v57 }
 0x236   :  { %2423 = vmatprep.subr.bf16.mxu0 %v3809_v58 }
 0x239   :  { %2424 = vmatpush1.bf16.msra.mxu0 %v3807_v59 }
 0x23a   :  { %2425 = vmatprep.subr.bf16.mxu0 %v3812_v60  ;;  %v2873_v60 = vand.u32 127, %v343_v7 }
 0x23c   :  { %vm2875_vm2 = vcmp.ge.s32.totalorder %v2873_v60, 9  ;;  %vm2876_vm3 = vcmp.lt.s32.totalorder %v2873_v60, 24  ;;  %vm2874_vm4 = vcmp.lt.s32.totalorder %v2873_v60, 9 }
 0x23d   :  { %2426 = vmatpush1.bf16.msra.mxu0 %v3810_v61  ;;  %vm4199_vm6 = vmand %vm2875_vm2, %vm2876_vm3 }
 0x23e   :  { %2427 = vmatprep.subr.bf16.mxu0 %v3815_v62 }
 0x241   :  { %2428 = vmatpush1.bf16.msra.mxu0 %v3813_v63 }
 0x242   :  { %2429 = vmatprep.subr.bf16.mxu0 %v3818_v1 }
 0x245   :  { %2430 = vmatpush1.bf16.msra.mxu0 %v3816_v2 }
 0x246   :  { %2431 = vmatprep.subr.bf16.mxu0 %v3821_v4 }
 0x249   :  { %2432 = vmatpush1.bf16.msra.mxu0 %v3819_v5 }
 0x24a   :  { %2433 = vmatprep.subr.bf16.mxu0 %v3824_v8 }
 0x24d   :  { %2434 = vmatpush1.bf16.msra.mxu0 %v3822_v9 }
 0x250   :  { %2436 = vmatmul.mubr.bf16.vlgmr.msra.gmra.mrb[4].mxu0 %v1964_v10 }
 0x323   :  { %v2437_v22 = vpop.f32.mrb[4].mxu0 }
 0x324   :  { %v3315_v23 = vadd.f32 %v2437_v22, %v2035_v20  ;;  %v2439_v24 = vpop.f32.mrb[5].mxu0 }
 0x325   :  { %v3316_v25 = vadd.f32 %v2439_v24, %v2039_v21  ;;  %v2441_v26 = vpop.f32.mrb[6].mxu0 }
 0x326   :  { %v2444_v27 = vmax.f32 %v3315_v23, 0.0  ;;  %v2442_v28 = vpop.f32.mrb[7].mxu0 }
 0x327   :  { %v2445_v29 = vmax.f32 %v3316_v25, 0.0 }
 0x328   :  { %v2446_v32 = vpack.c.bf16 %v2444_v27, %v2444_v27 }
 0x329   :  { %v2447_v30 = vpack.c.bf16 %v2445_v29, %v2445_v29 }
 0x32b   :  { %2684 = vmatprep.mubr.bf16.mxu1 %v2447_v30 }
 0x32c   :  { %2685 = vmatmul.mubr.bf16.vlgmr.msra.gmra.mrb[4].mxu1 %v2446_v32 }
 0x32d   :  { %3290 = vmatpush3.bf16.msra.mxu1 %v3874_v31 }
 0x32e   :  { %3291 = vmatprep.subr.bf16.mxu1 %v3875_v33 }
 0x331   :  { %3292 = vmatpush3.bf16.msra.mxu1 %v3876_v34 }
 0x332   :  { %3293 = vmatprep.subr.bf16.mxu1 %v3877_v35 }
 0x335   :  { %3294 = vmatpush3.bf16.msra.mxu1 %v3878_v36 }
 0x336   :  { %3295 = vmatprep.subr.bf16.mxu1 %v3879_v37 }
 0x339   :  { %3296 = vmatpush3.bf16.msra.mxu1 %v3880_v38 }
 0x33a   :  { %3297 = vmatprep.subr.bf16.mxu1 %v3881_v39 }
 0x33d   :  { %3298 = vmatpush3.bf16.msra.mxu1 %v3882_v40 }
 0x33e   :  { %3299 = vmatprep.subr.bf16.mxu1 %v3883_v41 }
 0x341   :  { %3300 = vmatpush3.bf16.msra.mxu1 %v3884_v42 }
 0x342   :  { %3301 = vmatprep.subr.bf16.mxu1 %v3885_v43 }
 0x345   :  { %3302 = vmatpush3.bf16.msra.mxu1 %v3886_v44 }
 0x346   :  { %3303 = vmatprep.subr.bf16.mxu1 %v3887_v45 }
 0x349   :  { %3304 = vmatpush3.bf16.msra.mxu1 %v3888_v46 }
 0x3ff   :  { %v2686_v50 = vpop.f32.mrb[4].mxu1 }
 0x400   :  { %v2687_v51 = vadd.f32 %v2686_v50, %v2485_v48  ;;  %v2688_v52 = vpop.f32.mrb[5].mxu1 }
 0x401   :  { %v2689_v53 = vadd.f32 %v2688_v52, %v2489_v49  ;;  %v2690_v54 = vpop.f32.mrb[6].mxu1 }
 0x402   :  { %v2693_v55 = vmax.f32 %v2687_v51, 0.0  ;;  %v2691_v56 = vpop.f32.mrb[7].mxu1 }
 0x403   :  { %v2694_v57 = vmax.f32 %v2689_v53, 0.0 }
 0x404   :  { %v2695_v59 = vpack.c.bf16 %v2693_v55, %v2693_v55 }
 0x405   :  { %v2696_v58 = vpack.c.bf16 %v2694_v57, %v2694_v57 }
 0x407   :  { %2864 = vmatprep.mubr.bf16.mxu1 %v2696_v58 }
 0x408   :  { %2865 = vmatmul.mubr.bf16.vlgmr.msra.gmra.mrb[8].mxu1 %v2695_v59 }
 0x4db   :  { %v3305_v61 = vpop.f32.mrb[8].mxu1 }
 0x4dc   :  { %v3306_v16 = vpop.f32.mrb[9].mxu1 }
 0x4dd   :  { %v3307_v62 = vadd.f32 %v3306_v16, %v3305_v61  ;;  %v3308_v63 = vpop.f32.mrb[10].mxu1 }
 0x4de   :  { %v3309_v0 = vpop.f32.mrb[11].mxu1 }
 0x4df   :  { %v2867_v1 = vadd.f32 %v3307_v62, %v3272_v13 }
 0x4e1   :  { %v2878_v7 = vsel %vm2874_vm4, %v2867_v1, -1e+30  ;;  %v2883_v4 = vsel %vm4199_vm6, %v2867_v1, -1e+30 }
 0x4e2   :  { %v2880_v3 = vsel %vm2879_vm5, %v2878_v7, -inf  ;;  %v2884_v5 = vsel %vm2879_vm5, %v2883_v4, -inf }
 0x4e3   :  { %2881 = vmax.xlane.f32.xlu0 %v2880_v3 }
 0x4e7   :  { %2885 = vmax.xlane.f32.xlu0 %v2884_v5 }
 0x570   :  { %v2882_v6 = vpop.xlane.xlu0 %2881 }
 0x574   :  { %v2886_v8 = vpop.xlane.xlu0 %2885 }
 0x575   :  { %v2887_v9 = vsel %vm2874_vm4, %v2882_v6, %v2886_v8 }
 0x576   :  { %v2888_v11 = vsub.f32 %v2867_v1, %v2887_v9 }
 0x578   :  { %v2889_v10 = vmul.f32 1.442695, %v2888_v11 }
 0x57a   :  { %3889 = vpow2.f32 %v2889_v10 }
 0x584   :  { %v3890_v12 = vpop.eup %3889 }
 0x585   :  { %v2891_v14 = vsel %vm2876_vm3, %v3890_v12, 0.0 }
 0x586   :  { %v2892_v15 = vsel %vm2874_vm4, %v2891_v14, 0.0  ;;  %v2896_v18 = vsel %vm4199_vm6, %v2891_v14, 0.0 }
 0x587   :  { %v2893_v17 = vsel %vm2879_vm5, %v2892_v15, 0.0  ;;  %v2897_v19 = vsel %vm2879_vm5, %v2896_v18, 0.0 }
 0x588   :  { %2894 = vadd.xlane.f32.xlu1 %v2893_v17 }
 0x58c   :  { %2898 = vadd.xlane.f32.xlu1 %v2897_v19 }
 0x615   :  { %v2895_v20 = vpop.xlane.xlu1 %2894 }
 0x619   :  { %v2899_v21 = vpop.xlane.xlu1 %2898 }
 0x61a   :  { %v2900_v22 = vsel %vm2874_vm4, %v2895_v20, %v2899_v21 }
 0x61b   :  { %3891 = vrcp.f32 %v2900_v22 }
 0x625   :  { %v3892_v23 = vpop.eup %3891 }
 0x626   :  { %v2902_v24 = vmul.f32 %v3892_v23, %v2891_v14 }
 0x628   :  { %2903 = vst.msk [vmem:[#allocation8] sm:$0xff] %vm2879_vm5, %v2902_v24 }
 0x629   :  { %3970 = shalt.err (!%p3967_p0)
}
 0x62a   :  { %s3971_s29 = scalar_lea.hbm %s4238_s9, 128 }
 0x62b   :  { %p3972_p1 = scmp.ne.s32.totalorder %s4238_s9, %s3971_s29  ;;  %p3975_p2 = scmp.lt.u32.totalorder %s3971_s29, %s4238_s9 }
 0x62d   :  { %p3977_p3 = pnand %p3975_p2, %p3972_p1 }
 0x62f   :  { %3980 = shalt.err (!%p3977_p3)
}
 0x630   :  { %2913 = dma.vmem_to_hbm [thread:$0]  %s2911_s5, 128, %s4238_s9, [#allocation4]  }
 0x631   :  { %3985 = dma.done.wait [#allocation4], 128  }
 0x632   :  { %3986 = vsyncadd [#allocation4], 4294967168 }
 0x633   :  { %2917 = vsyncpa [#allocation3], 1 }
 0x634   :  { %2918 = vsyncpa [#allocation6], 1 }
 0x635   :  { %2919 = vsyncpa [#allocation4], 1 }

</bundles_post_ra>
